<compile_context>
chip_gen: v5e
topology: v5e:2x2
jax: 0.10.0
libtpu: 0.0.40
codegen_flags: <defaults>
</compile_context>

<pallas_src>
import functools

import jax
import jax.numpy as jnp
import numpy as np
from jax.experimental import pallas as pl
from jax.experimental.pallas import tpu as pltpu


def _bloch_kernel(theta_ref, w_ref, x_ref, out_ref, *, L, lane_chunk, n_chunks):
    """Bloch-vector layer stack; one big batch tile per grid step.

    theta_ref, w_ref : (L*3,) f32 in SMEM (scalar reads)
    x_ref            : (1, 3, SB, LB) f32 in VMEM  (feature-major batch tile)
    out_ref          : (1, 3, SB, LB) f32 in VMEM, planes = [bx, by, bz]
    The kernel walks the LB lane axis in `lane_chunk`-wide chunks so the
    per-chunk live set (~14 arrays) stays within the vreg file.
    """
    # Hoist SMEM scalar parameter reads out of the chunk loop.
    th = [theta_ref[i] for i in range(3 * L)]
    wv = [w_ref[i] for i in range(3 * L)]
    # Merged Rz constants at layer boundaries (scalar adds, once per tile).
    a_merge = [th[3 * (l - 1) + 2] + th[3 * l] for l in range(1, L)]

    def chunk(off):
        sl = pl.ds(off, lane_chunk)
        x0 = x_ref[0, 0, :, sl]
        x1 = x_ref[0, 1, :, sl]
        x2 = x_ref[0, 2, :, sl]

        # ---- layer 0: rho = |0><0|  =>  Bloch r = (0, 0, 1).
        # Leading Rz(phi0_0) leaves (0,0,1) invariant; trailing Rz(phi2_0) is
        # folded into the next boundary (or the epilogue when L == 1).
        phi = th[1] + wv[1] * x1
        bx = jnp.sin(phi)
        bz = jnp.cos(phi)
        by = jnp.zeros_like(bx)

        # ---- interior layers, merged Rz at each boundary:
        #   Rz(phi0_l) @ Rz(phi2_{l-1}) == Rz(phi2_{l-1} + phi0_l)
        for l in range(1, L):
            psi = (a_merge[l - 1] + wv[3 * (l - 1) + 2] * x2) + wv[3 * l] * x0
            s0 = jnp.sin(psi)
            c0 = jnp.cos(psi)
            tx = bx * c0 - by * s0          # Rz about z
            ty = bx * s0 + by * c0
            phi = th[3 * l + 1] + wv[3 * l + 1] * x1
            s1 = jnp.sin(phi)
            c1 = jnp.cos(phi)
            bx = tx * c1 + bz * s1          # Ry about y
            bz = bz * c1 - tx * s1
            by = ty

        # ---- trailing Rz(phi2_{L-1}) of the last layer.
        phi = th[3 * (L - 1) + 2] + wv[3 * (L - 1) + 2] * x2
        s2 = jnp.sin(phi)
        c2 = jnp.cos(phi)
        fx = bx * c2 - by * s2
        fy = bx * s2 + by * c2

        out_ref[0, 0, :, sl] = fx
        out_ref[0, 1, :, sl] = fy
        out_ref[0, 2, :, sl] = bz

    if n_chunks == 1:
        chunk(0)
    else:
        @pl.loop(0, n_chunks)
        def _(ci):
            chunk(pl.multiple_of(ci * lane_chunk, lane_chunk))


def classifier_original_forward(x, theta, w, *, sb=8, lane_chunk=256,
                                max_lanes=8192):
    """ClassifierOriginal.forward. x: (B, 3) f32; theta, w: (L, 3) f32.

    Returns rho: (B, 2, 2) complex64.
    """
    B, D = x.shape
    L = theta.shape[0]
    if D != 3:
        raise ValueError("QLayerOriginal (ZYZ) requires D == 3 features.")
    if theta.shape != (L, 3) or w.shape != (L, 3):
        raise ValueError("theta / w must have shape (L, 3).")
    if L < 1:
        raise ValueError("Need at least one layer.")
    if max_lanes % lane_chunk != 0 or lane_chunk % 128 != 0:
        raise ValueError("max_lanes must be a multiple of lane_chunk (%128).")

    # Choose a lane width: as large as needed to cover the batch (fewer grid
    # steps / bigger DMAs), capped at max_lanes so the double-buffered tile
    # stays a few MiB (well under v5e's 16 MiB / v7x's 32 MiB scoped VMEM).
    rows = -(-B // sb)
    lanes_needed = -(-rows // lane_chunk) * lane_chunk
    lb = min(max_lanes, lanes_needed)
    tile = sb * lb
    n_tiles = -(-B // tile)
    b_pad = n_tiles * tile
    n_chunks = lb // lane_chunk

    # (B, 3) -> pad -> (n_tiles, SB, LB, 3) -> (n_tiles, 3, SB, LB)
    x_pad = jnp.pad(x.astype(jnp.float32), ((0, b_pad - B), (0, 0)))
    x_tiled = x_pad.reshape(n_tiles, sb, lb, D).transpose(0, 3, 1, 2)

    kernel = functools.partial(_bloch_kernel, L=L, lane_chunk=lane_chunk,
                               n_chunks=n_chunks)
    bloch = pl.pallas_call(
        kernel,
        out_shape=jax.ShapeDtypeStruct((n_tiles, 3, sb, lb), jnp.float32),
        grid=(n_tiles,),
        in_specs=[
            pl.BlockSpec(memory_space=pltpu.MemorySpace.SMEM),  # theta (L*3,)
            pl.BlockSpec(memory_space=pltpu.MemorySpace.SMEM),  # w     (L*3,)
            pl.BlockSpec((1, D, sb, lb), lambda i: (i, 0, 0, 0)),
        ],
        out_specs=pl.BlockSpec((1, 3, sb, lb), lambda i: (i, 0, 0, 0)),
        compiler_params=pltpu.CompilerParams(
            dimension_semantics=("parallel",)),
    )(theta.reshape(-1).astype(jnp.float32),
      w.reshape(-1).astype(jnp.float32),
      x_tiled)

    # (n_tiles, 3, SB, LB) -> (B, 3) Bloch components -> rho = (I + r.sigma)/2
    r = bloch.transpose(0, 2, 3, 1).reshape(b_pad, 3)[:B]
    bx, by, bz = r[:, 0], r[:, 1], r[:, 2]
    half = jnp.float32(0.5)
    zero = jnp.zeros_like(bx)
    re = jnp.stack(
        [jnp.stack([(1.0 + bz) * half, bx * half], axis=-1),
         jnp.stack([bx * half, (1.0 - bz) * half], axis=-1)], axis=-2)
    im = jnp.stack(
        [jnp.stack([zero, -by * half], axis=-1),
         jnp.stack([by * half, zero], axis=-1)], axis=-2)
    return jax.lax.complex(re, im)


def _reference_forward(x, theta, w):
    """Pure-JAX reference (complex 2x2 matmuls) for validation."""
    B = x.shape[0]
    L = theta.shape[0]
    rho = jnp.zeros((B, 2, 2), jnp.complex64).at[:, 0, 0].set(1.0)
    for l in range(L):
        phi = theta[l][None, :] + w[l][None, :] * x[:, :3]       # (B, 3)
        c = jnp.cos(phi[:, 1] * 0.5)
        s = jnp.sin(phi[:, 1] * 0.5)
        ap = (phi[:, 0] + phi[:, 2]) * 0.5
        am = (phi[:, 0] - phi[:, 2]) * 0.5
        u00 = c * jnp.exp(-1j * ap)
        u01 = -s * jnp.exp(1j * am)
        u10 = s * jnp.exp(-1j * am)
        u11 = c * jnp.exp(1j * ap)
        U = jnp.stack([jnp.stack([u00, u01], -1),
                       jnp.stack([u10, u11], -1)], -2)           # (B, 2, 2)
        rho = jnp.einsum('bik,bkl,bjl->bij', U, rho, jnp.conj(U))
    return rho


if __name__ == "__main__":
    # ---- primary small config (B=8, D=3, L=2) ------------------------------
    key = jax.random.PRNGKey(0)
    B, D, L, C = 8, 3, 2, 2
    k_x, k_t, k_w = jax.random.split(key, 3)
    x = jax.random.normal(k_x, (B, D), jnp.float32)
    theta = jax.random.normal(k_t, (L, D), jnp.float32)   # QLayerOriginal params
    w = jax.random.normal(k_w, (L, D), jnp.float32)

    # Parameters of SingeQubitClassifier.__init__ (unused by forward).
    alpha = jnp.ones((C,), jnp.float32)
    psi_c = jnp.eye(2, dtype=jnp.complex64)                # C == 2 case

    rho = jax.block_until_ready(classifier_original_forward(x, theta, w))
    rho_ref = _reference_forward(x, theta, w)
    np.testing.assert_allclose(np.asarray(rho), np.asarray(rho_ref),
                               rtol=1e-4, atol=1e-5)
    np.testing.assert_allclose(
        np.real(np.trace(np.asarray(rho), axis1=1, axis2=2)),
        np.ones(B), rtol=1e-5, atol=1e-5)

    # ---- secondary config exercising the in-kernel lane-chunk loop / L=3 ---
    B2, L2 = 2500, 3
    k_x2, k_t2, k_w2 = jax.random.split(jax.random.PRNGKey(1), 3)
    x2 = jax.random.normal(k_x2, (B2, D), jnp.float32)
    theta2 = jax.random.normal(k_t2, (L2, D), jnp.float32)
    w2 = jax.random.normal(k_w2, (L2, D), jnp.float32)
    rho2 = jax.block_until_ready(classifier_original_forward(x2, theta2, w2))
    rho2_ref = _reference_forward(x2, theta2, w2)
    np.testing.assert_allclose(np.asarray(rho2), np.asarray(rho2_ref),
                               rtol=1e-4, atol=1e-5)

    print("KERNEL_OK")
</pallas_src>

<mosaic_0001>
module attributes {stable_mosaic.version = 11 : i64} {
  func.func @_bloch_kernel(%arg0: i32, %arg1: memref<6xf32, #tpu.memory_space<smem>>, %arg2: memref<6xf32, #tpu.memory_space<smem>>, %arg3: memref<1x3x8x256xf32, #tpu.memory_space<vmem>>, %arg4: memref<1x3x8x256xf32, #tpu.memory_space<vmem>>) attributes {dimension_semantics = [#tpu.dimension_semantics<parallel>], iteration_bounds = array<i64: 1>, scalar_prefetch = 0 : i64, scratch_operands = 0 : i64, tpu.core_type = #tpu.core_type<tc>, window_params = [{transform_indices = @transform_0, window_bounds = array<i64: 6>}, {transform_indices = @transform_1, window_bounds = array<i64: 6>}, {transform_indices = @transform_2, window_bounds = array<i64: 1, 3, 8, 256>}, {transform_indices = @transform_3, window_bounds = array<i64: 1, 3, 8, 256>}]} {
    %c1 = arith.constant 1 : index
    %0 = memref.load %arg1[%c1] : memref<6xf32, #tpu.memory_space<smem>>
    %c2 = arith.constant 2 : index
    %1 = memref.load %arg1[%c2] : memref<6xf32, #tpu.memory_space<smem>>
    %c3 = arith.constant 3 : index
    %2 = memref.load %arg1[%c3] : memref<6xf32, #tpu.memory_space<smem>>
    %c4 = arith.constant 4 : index
    %3 = memref.load %arg1[%c4] : memref<6xf32, #tpu.memory_space<smem>>
    %c5 = arith.constant 5 : index
    %4 = memref.load %arg1[%c5] : memref<6xf32, #tpu.memory_space<smem>>
    %c1_0 = arith.constant 1 : index
    %5 = memref.load %arg2[%c1_0] : memref<6xf32, #tpu.memory_space<smem>>
    %c2_1 = arith.constant 2 : index
    %6 = memref.load %arg2[%c2_1] : memref<6xf32, #tpu.memory_space<smem>>
    %c3_2 = arith.constant 3 : index
    %7 = memref.load %arg2[%c3_2] : memref<6xf32, #tpu.memory_space<smem>>
    %c4_3 = arith.constant 4 : index
    %8 = memref.load %arg2[%c4_3] : memref<6xf32, #tpu.memory_space<smem>>
    %c5_4 = arith.constant 5 : index
    %9 = memref.load %arg2[%c5_4] : memref<6xf32, #tpu.memory_space<smem>>
    %10 = arith.addf %1, %2 : f32
    %c0 = arith.constant 0 : index
    %c0_5 = arith.constant 0 : index
    %c0_6 = arith.constant 0 : index
    %c0_7 = arith.constant 0 : index
    %11 = vector.load %arg3[%c0, %c0_5, %c0_6, %c0_7] : memref<1x3x8x256xf32, #tpu.memory_space<vmem>>, vector<1x1x8x256xf32>
    %12 = vector.shape_cast %11 : vector<1x1x8x256xf32> to vector<8x256xf32>
    %c0_8 = arith.constant 0 : index
    %c1_9 = arith.constant 1 : index
    %c0_10 = arith.constant 0 : index
    %c0_11 = arith.constant 0 : index
    %13 = vector.load %arg3[%c0_8, %c1_9, %c0_10, %c0_11] : memref<1x3x8x256xf32, #tpu.memory_space<vmem>>, vector<1x1x8x256xf32>
    %14 = vector.shape_cast %13 : vector<1x1x8x256xf32> to vector<8x256xf32>
    %c0_12 = arith.constant 0 : index
    %c2_13 = arith.constant 2 : index
    %c0_14 = arith.constant 0 : index
    %c0_15 = arith.constant 0 : index
    %15 = vector.load %arg3[%c0_12, %c2_13, %c0_14, %c0_15] : memref<1x3x8x256xf32, #tpu.memory_space<vmem>>, vector<1x1x8x256xf32>
    %16 = vector.shape_cast %15 : vector<1x1x8x256xf32> to vector<8x256xf32>
    %17 = vector.broadcast %5 : f32 to vector<8x256xf32>
    %18 = arith.mulf %17, %14 : vector<8x256xf32>
    %19 = vector.broadcast %0 : f32 to vector<8x256xf32>
    %20 = arith.addf %19, %18 : vector<8x256xf32>
    %21 = math.sin %20 : vector<8x256xf32>
    %22 = math.cos %20 : vector<8x256xf32>
    %cst = arith.constant 0.000000e+00 : f32
    %23 = vector.broadcast %cst : f32 to vector<8x256xf32>
    %24 = vector.broadcast %6 : f32 to vector<8x256xf32>
    %25 = arith.mulf %24, %16 : vector<8x256xf32>
    %26 = vector.broadcast %10 : f32 to vector<8x256xf32>
    %27 = arith.addf %26, %25 : vector<8x256xf32>
    %28 = vector.broadcast %7 : f32 to vector<8x256xf32>
    %29 = arith.mulf %28, %12 : vector<8x256xf32>
    %30 = arith.addf %27, %29 : vector<8x256xf32>
    %31 = math.sin %30 : vector<8x256xf32>
    %32 = math.cos %30 : vector<8x256xf32>
    %33 = arith.mulf %21, %32 : vector<8x256xf32>
    %34 = arith.mulf %23, %31 : vector<8x256xf32>
    %35 = arith.subf %33, %34 : vector<8x256xf32>
    %36 = arith.mulf %21, %31 : vector<8x256xf32>
    %37 = arith.mulf %23, %32 : vector<8x256xf32>
    %38 = arith.addf %36, %37 : vector<8x256xf32>
    %39 = vector.broadcast %8 : f32 to vector<8x256xf32>
    %40 = arith.mulf %39, %14 : vector<8x256xf32>
    %41 = vector.broadcast %3 : f32 to vector<8x256xf32>
    %42 = arith.addf %41, %40 : vector<8x256xf32>
    %43 = math.sin %42 : vector<8x256xf32>
    %44 = math.cos %42 : vector<8x256xf32>
    %45 = arith.mulf %35, %44 : vector<8x256xf32>
    %46 = arith.mulf %22, %43 : vector<8x256xf32>
    %47 = arith.addf %45, %46 : vector<8x256xf32>
    %48 = arith.mulf %22, %44 : vector<8x256xf32>
    %49 = arith.mulf %35, %43 : vector<8x256xf32>
    %50 = arith.subf %48, %49 : vector<8x256xf32>
    %51 = vector.broadcast %9 : f32 to vector<8x256xf32>
    %52 = arith.mulf %51, %16 : vector<8x256xf32>
    %53 = vector.broadcast %4 : f32 to vector<8x256xf32>
    %54 = arith.addf %53, %52 : vector<8x256xf32>
    %55 = math.sin %54 : vector<8x256xf32>
    %56 = math.cos %54 : vector<8x256xf32>
    %57 = arith.mulf %47, %56 : vector<8x256xf32>
    %58 = arith.mulf %38, %55 : vector<8x256xf32>
    %59 = arith.subf %57, %58 : vector<8x256xf32>
    %60 = arith.mulf %47, %55 : vector<8x256xf32>
    %61 = arith.mulf %38, %56 : vector<8x256xf32>
    %62 = arith.addf %60, %61 : vector<8x256xf32>
    %c0_16 = arith.constant 0 : index
    %c0_17 = arith.constant 0 : index
    %c0_18 = arith.constant 0 : index
    %c0_19 = arith.constant 0 : index
    %63 = vector.load %arg4[%c0_16, %c0_17, %c0_18, %c0_19] : memref<1x3x8x256xf32, #tpu.memory_space<vmem>>, vector<1x1x8x256xf32>
    %64 = vector.shape_cast %63 : vector<1x1x8x256xf32> to vector<8x256xf32>
    %65 = vector.shape_cast %59 : vector<8x256xf32> to vector<1x1x8x256xf32>
    tpu.vector_store %arg4[%c0_16, %c0_17, %c0_18, %c0_19], %65 {strides = array<i32>} : memref<1x3x8x256xf32, #tpu.memory_space<vmem>>, vector<1x1x8x256xf32>,
    %c0_20 = arith.constant 0 : index
    %c1_21 = arith.constant 1 : index
    %c0_22 = arith.constant 0 : index
    %c0_23 = arith.constant 0 : index
    %66 = vector.load %arg4[%c0_20, %c1_21, %c0_22, %c0_23] : memref<1x3x8x256xf32, #tpu.memory_space<vmem>>, vector<1x1x8x256xf32>
    %67 = vector.shape_cast %66 : vector<1x1x8x256xf32> to vector<8x256xf32>
    %68 = vector.shape_cast %62 : vector<8x256xf32> to vector<1x1x8x256xf32>
    tpu.vector_store %arg4[%c0_20, %c1_21, %c0_22, %c0_23], %68 {strides = array<i32>} : memref<1x3x8x256xf32, #tpu.memory_space<vmem>>, vector<1x1x8x256xf32>,
    %c0_24 = arith.constant 0 : index
    %c2_25 = arith.constant 2 : index
    %c0_26 = arith.constant 0 : index
    %c0_27 = arith.constant 0 : index
    %69 = vector.load %arg4[%c0_24, %c2_25, %c0_26, %c0_27] : memref<1x3x8x256xf32, #tpu.memory_space<vmem>>, vector<1x1x8x256xf32>
    %70 = vector.shape_cast %69 : vector<1x1x8x256xf32> to vector<8x256xf32>
    %71 = vector.shape_cast %50 : vector<8x256xf32> to vector<1x1x8x256xf32>
    tpu.vector_store %arg4[%c0_24, %c2_25, %c0_26, %c0_27], %71 {strides = array<i32>} : memref<1x3x8x256xf32, #tpu.memory_space<vmem>>, vector<1x1x8x256xf32>,
    return
  }
  func.func @transform_0(%arg0: i32) -> i32 {
    %c0_i32 = arith.constant 0 : i32
    %c0_i32_0 = arith.constant 0 : i32
    return %c0_i32 : i32
  }
  func.func @transform_1(%arg0: i32) -> i32 {
    %c0_i32 = arith.constant 0 : i32
    %c0_i32_0 = arith.constant 0 : i32
    return %c0_i32 : i32
  }
  func.func @transform_2(%arg0: i32) -> (i32, i32, i32, i32) {
    %c0_i32 = arith.constant 0 : i32
    %c0_i32_0 = arith.constant 0 : i32
    %c0_i32_1 = arith.constant 0 : i32
    %c0_i32_2 = arith.constant 0 : i32
    return %arg0, %c0_i32, %c0_i32_0, %c0_i32_1 : i32, i32, i32, i32
  }
  func.func @transform_3(%arg0: i32) -> (i32, i32, i32, i32) {
    %c0_i32 = arith.constant 0 : i32
    %c0_i32_0 = arith.constant 0 : i32
    %c0_i32_1 = arith.constant 0 : i32
    %c0_i32_2 = arith.constant 0 : i32
    return %arg0, %c0_i32, %c0_i32_0, %c0_i32_1 : i32, i32, i32, i32
  }
}

</mosaic_0001>

<bundles_post_ra>
// kernel: tpu_custom_call.1
= control target key start
LH: loop header
LB: loop body
LE: loop exit
PB: predicated region body
PF: predicated region fallthrough
CT: control target
= control target key end

     0   :  { %8 = vsyncpa [#allocation5], 0  ;;  %s3976_s0 = inlined_call_operand.hbm [shape: f32[6], index: 0, kind: input, shape index: {}]   ;;  %s3977_s1 = inlined_call_operand.hbm [shape: f32[6], index: 1, kind: input, shape index: {}]   ;;  %s3978_s2 = inlined_call_operand.hbm [shape: f32[1,3,8,256], index: 2, kind: input, shape index: {}]   ;;  %s3979_s3 = inlined_call_operand.hbm [shape: f32[1,3,8,256], index: 3, kind: output, shape index: {}]  }
   0x1   :  { %9 = vsyncpa [#allocation7], 0 }
   0x2   :  { %10 = vsyncpa [#allocation3], 0 }
   0x3   :  { %11 = vsyncpa [#allocation4], 0  ;;  %s17_s14 = sshll.u32 %s3976_s0, 4  ;;  %s26_s17 = sshll.u32 %s3977_s1, 4  ;;  %s18_s14 = int_to_ptr.hbm [resolvable:$true] %s17_s14  ;;  %s27_s17 = int_to_ptr.hbm [resolvable:$true] %s26_s17 }
   0x4   :  { %s2795_s18 = smov [#allocation2]   ;;  %s2796_s19 = smov [#allocation6]  }
   0x5   :  { %20 = dma.hbm_to_smem %s18_s14, 16, %s2795_s18, [#allocation5]  }
   0x6   :  { %29 = dma.hbm_to_smem %s27_s17, 16, %s2796_s19, [#allocation7]  }
   0x7   :  { %s34_s22 = sshll.u32 %s3978_s2, 4  ;;  %s2797_s23 = smov [#allocation8]   ;;  %s35_s22 = int_to_ptr.hbm [resolvable:$true] %s34_s22 }
   0x8   :  { %s36_s24 = sshll.u32 %s2797_s23, 4  ;;  %s2798_s25 = smov 256   ;;  %s37_s24 = int_to_ptr.vmem [resolvable:$true] %s36_s24 }
   0x9   :  { %s2799_s0 = smov 16  }
   0xa   :  { %42 = dma.hbm_to_vmem [thread:$0]  %s35_s22, 768, %s37_s24, [#allocation3], %s2798_s25, %s2798_s25, %s2799_s0  }
   0xb   :  { %2787 = dma.done.wait [#allocation5], 16  }
   0xc   :  { %2788 = vsyncadd [#allocation5], 4294967280 }
   0xd   :  { %2789 = dma.done.wait [#allocation7], 16  }
   0xe   :  { %2790 = vsyncadd [#allocation7], 4294967280 }
   0xf   :  { %2791 = dma.done.wait [#allocation3], 768  }
  0x10   :  { %2792 = vsyncadd [#allocation3], 4294966528 }
  0x11   :  { %55 = sfence }
  0x12   :  { %s2642_s1 = sld [smem:[#allocation2 + $0x2]]  ;;  %v2844_v0 = vld [vmem:[#allocation8 + $0x10] sm:$0xff]  ;;  %v71_v1 = vld [vmem:[#allocation8 + $0x18] sm:$0xff]  ;;  %v73_v2 = vld [vmem:[#allocation8 + $0x20] sm:$0xff]  ;;  %v2800_v41 = vmov 683565275  }
  0x13   :  { %s2643_s26 = sld [smem:[#allocation2 + $0x3]]  ;;  %v67_v3 = vld [vmem:[#allocation8] sm:$0xff]  ;;  %v2801_v43 = vmov 2475754826   ;;  %v2802_v45 = vmov 2131351028  }
  0x14   :  { %s2641_s2 = sld [smem:[#allocation2 + $0x1]]  ;;  %v2803_v47 = vmov 2102212464   ;;  %v2804_v49 = vmov 920167782   ;;  %s2807_s8 = smov [#allocation9]  }
  0x15   :  { %s2646_s27 = sld [smem:[#allocation6 + $0x1]]  ;;  %v3981_v58 = vmov 1326507024   ;;  %s2624_s9 = sshll.u32 %s2807_s8, 4  ;;  %s2625_s9 = int_to_ptr.vmem [resolvable:$true] %s2624_s9 }
  0x16   :  { %s2840_s28 = sld [smem:[#allocation6 + $0x2]]  ;;  %s2626_s12 = sshll.u32 %s3979_s3, 4  ;;  %s2627_s12 = int_to_ptr.hbm [resolvable:$true] %s2626_s12 }
  0x17   :  { %s2842_s29 = sld [smem:[#allocation6 + $0x3]] }
  0x18   :  { %s3163_s4 = sld [smem:[#allocation6 + $0x4]] }
  0x19   :  { %s66_s30 = sadd.f32 %s2643_s26, %s2642_s1 }
  0x1a   :  { %v78_v5 = vstv %s2641_s2  ;;  %s3171_s5 = sld [smem:[#allocation2 + $0x4]] }
  0x1b   :  { %v75_v4 = vstv %s2646_s27  ;;  %v2850_v10 = vstv %s66_s30  ;;  %s3518_s6 = sld [smem:[#allocation6 + $0x5]] }
  0x1c   :  { %v76_v6 = vmul.f32 %v75_v4, %v2844_v0  ;;  %v77_v7 = vmul.f32 %v75_v4, %v71_v1  ;;  %v699_v8 = vstv %s2840_s28  ;;  %s3592_s7 = sld [smem:[#allocation2 + $0x5]] }
  0x1d   :  { %v700_v9 = vmul.f32 %v699_v8, %v73_v2  ;;  %v705_v11 = vstv %s2842_s29 }
  0x1e   :  { %v2853_v12 = vadd.f32 %v78_v5, %v76_v6  ;;  %v2855_v13 = vadd.f32 %v78_v5, %v77_v7  ;;  %v706_v14 = vmul.f32 %v705_v11, %v67_v3 }
  0x1f   :  { %v703_v15 = vadd.f32 %v2850_v10, %v700_v9 }
  0x20   :  { %v81_v16 = vand.u32 2147483647, %v2853_v12  ;;  %v84_v17 = vand.u32 2139095040, %v2853_v12  ;;  %v236_v18 = vand.u32 2147483647, %v2855_v13  ;;  %v239_v19 = vand.u32 2139095040, %v2855_v13 }
  0x21   :  { %v2864_v20 = vadd.f32 %v706_v14, %v703_v15 }
  0x22   :  { %v85_v21 = vshrl.u32 %v84_v17, 23  ;;  %v88_v22 = vand.u32 8388607, %v81_v16  ;;  %v240_v23 = vshrl.u32 %v239_v19, 23  ;;  %v243_v24 = vand.u32 8388607, %v236_v18 }
  0x23   :  { %v713_v28 = vand.u32 2139095040, %v2864_v20 }
  0x24   :  { %v2651_v25 = vadd.s32 4294967169, %v85_v21  ;;  %v89_v26 = vor.u32 8388608, %v88_v22  ;;  %v2654_v27 = vadd.s32 4294967169, %v240_v23  ;;  %v244_v30 = vor.u32 8388608, %v243_v24 }
  0x25   :  { %v714_v34 = vshrl.u32 %v713_v28, 23 }
  0x26   :  { %v91_v29 = vadd.s32 1, %v2651_v25  ;;  %v246_v31 = vadd.s32 1, %v2654_v27  ;;  %v2871_v33 = vshll.u32 %v89_v26, 8  ;;  %v2877_v39 = vshll.u32 %v244_v30, 8 }
  0x27   :  { %v2885_v52 = vadd.s32 4294967169, %v714_v34 }
  0x28   :  { %vm92_vm0 = vcmp.gt.s32.totalorder %v91_v29, 0  ;;  %vm247_vm1 = vcmp.gt.s32.totalorder %v246_v31, 0  ;;  %v130_v51 = vand.u32 65535, %v2871_v33  ;;  %v131_v56 = vshrl.u32 %v2871_v33, 16 }
  0x29   :  { %v93_v32 = vsel %vm92_vm0, %v91_v29, 0  ;;  %v248_v36 = vsel %vm247_vm1, %v246_v31, 0 }
  0x2a   :  { %v95_v35 = vand.u32 31, %v93_v32  ;;  %v2873_v37 = vshrl.u32 %v93_v32, 5  ;;  %v2875_v38 = vand.u32 31, %v248_v36  ;;  %v2905_v6 = vshrl.u32 %v248_v36, 5 }
  0x2c   :  { %v96_v40 = vsub.s32 32, %v95_v35  ;;  %v98_v42 = vshll.u32 %v2800_v41, %v95_v35  ;;  %v101_v44 = vshll.u32 %v2801_v43, %v95_v35  ;;  %v104_v46 = vshll.u32 %v2802_v45, %v95_v35 }
  0x2d   :  { %v107_v48 = vshll.u32 %v2803_v47, %v95_v35  ;;  %v110_v50 = vshll.u32 %v2804_v49, %v95_v35  ;;  %vm113_vm2 = vcmp.lt.s32.totalorder %v2873_v37, 1  ;;  %vm116_vm3 = vcmp.lt.s32.totalorder %v2873_v37, 4 }
  0x2e   :  { %v99_v53 = vshrl.u32 %v2801_v43, %v96_v40  ;;  %v102_v54 = vshrl.u32 %v2802_v45, %v96_v40  ;;  %v105_v55 = vshrl.u32 %v2803_v47, %v96_v40  ;;  %v108_v57 = vshrl.u32 %v2804_v49, %v96_v40 }
  0x2f   :  { %v111_v59 = vshrl.u32 %v3981_v58, %v96_v40  ;;  %v2896_v63 = vsub.s32 32, %v2875_v38  ;;  %v97_v1 = vshrl.u32 %v2800_v41, %v96_v40  ;;  %vm115_vm4 = vcmp.lt.s32.totalorder %v2873_v37, 3 }
  0x30   :  { %v100_v60 = vor.u32 %v99_v53, %v98_v42  ;;  %v103_v61 = vor.u32 %v102_v54, %v101_v44  ;;  %v106_v62 = vor.u32 %v105_v55, %v104_v46  ;;  %v109_v2 = vor.u32 %v108_v57, %v107_v48 }
  0x31   :  { %v112_v3 = vor.u32 %v111_v59, %v110_v50  ;;  %vm114_vm5 = vcmp.lt.s32.totalorder %v2873_v37, 2  ;;  %v253_v14 = vshll.u32 %v2800_v41, %v2875_v38  ;;  %v256_v15 = vshll.u32 %v2801_v43, %v2875_v38 }
  0x32   :  { %v121_v4 = vsel %vm113_vm2, %v100_v60, %v103_v61  ;;  %v125_v5 = vsel %vm113_vm2, %v103_v61, %v106_v62  ;;  %v122_v7 = vsel %vm116_vm3, %v109_v2, 920167782  ;;  %v118_v17 = vsel %vm116_vm3, %v106_v62, 2102212464 }
  0x33   :  { %v126_v9 = vsel %vm116_vm3, %v112_v3, 1326507024  ;;  %v123_v19 = vsel %vm115_vm4, %v106_v62, %v122_v7  ;;  %v254_v22 = vshrl.u32 %v2801_v43, %v2896_v63  ;;  %v117_v23 = vsel %vm113_vm2, %v97_v1, %v100_v60 }
  0x34   :  { %v127_v21 = vsel %vm115_vm4, %v109_v2, %v126_v9  ;;  %v124_v24 = vsel %vm114_vm5, %v121_v4, %v123_v19  ;;  %v257_v26 = vshrl.u32 %v2802_v45, %v2896_v63  ;;  %v119_v31 = vsel %vm115_vm4, %v103_v61, %v118_v17 }
  0x35   :  { %v128_v25 = vsel %vm114_vm5, %v125_v5, %v127_v21  ;;  %v154_v29 = vand.u32 65535, %v124_v24  ;;  %v155_v30 = vshrl.u32 %v124_v24, 16  ;;  %v2933_v32 = vor.u32 %v254_v22, %v253_v14 }
  0x36   :  { %v132_v27 = vand.u32 65535, %v128_v25  ;;  %v133_v28 = vshrl.u32 %v128_v25, 16  ;;  %v2935_v34 = vor.u32 %v257_v26, %v256_v15  ;;  %v259_v35 = vshll.u32 %v2802_v45, %v2875_v38 }
  0x37   :  { %v260_v44 = vshrl.u32 %v2803_v47, %v2896_v63  ;;  %v156_v48 = vmul.u32 %v154_v29, %v130_v51  ;;  %v157_v50 = vmul.u32 %v155_v30, %v130_v51  ;;  %v158_v53 = vmul.u32 %v154_v29, %v131_v56 }
  0x38   :  { %v134_v36 = vmul.u32 %v132_v27, %v130_v51  ;;  %v135_v40 = vmul.u32 %v133_v28, %v130_v51  ;;  %v136_v42 = vmul.u32 %v132_v27, %v131_v56  ;;  %v137_v46 = vmul.u32 %v133_v28, %v131_v56 }
  0x39   :  { %v159_v59 = vmul.u32 %v155_v30, %v131_v56  ;;  %v160_v61 = vshll.u32 %v157_v50, 16  ;;  %v161_v62 = vshrl.u32 %v157_v50, 16  ;;  %v162_v1 = vshll.u32 %v158_v53, 16 }
  0x3a   :  { %v138_v54 = vshll.u32 %v135_v40, 16  ;;  %v139_v55 = vshrl.u32 %v135_v40, 16  ;;  %v140_v57 = vshll.u32 %v136_v42, 16  ;;  %v141_v60 = vshrl.u32 %v136_v42, 16 }
  0x3b   :  { %v163_v3 = vshrl.u32 %v158_v53, 16  ;;  %v262_v4 = vshll.u32 %v2803_v47, %v2875_v38  ;;  %v2806_v5 = vmov 0   ;;  %vm164_vm7 = vc.u32 %v156_v48, %v160_v61 }
  0x3c   :  { %vm142_vm6 = vc.u32 %v134_v36, %v138_v54  ;;  %v144_v2 = vadd.s32 %v138_v54, %v134_v36  ;;  %v166_v51 = vadd.s32 %v160_v61, %v156_v48  ;;  %v263_v9 = vshrl.u32 %v2804_v49, %v2896_v63 }
  0x3d   :  { %v143_v7 = vsel %vm142_vm6, 1, %v2806_v5  ;;  %v165_v56 = vsel %vm164_vm7, 1, %v2806_v5  ;;  %v265_v15 = vshll.u32 %v2804_v49, %v2875_v38  ;;  %v261_v21 = vor.u32 %v260_v44, %v259_v35 }
  0x3e   :  { %v145_v14 = vadd.s32 %v143_v7, %v137_v46  ;;  %vm146_vm8 = vc.u32 %v144_v2, %v140_v57  ;;  %v167_v19 = vadd.s32 %v165_v56, %v159_v59  ;;  %vm168_vm9 = vc.u32 %v166_v51, %v162_v1 }
  0x3f   :  { %v147_v17 = vsel %vm146_vm8, 1, %v2806_v5  ;;  %v169_v24 = vsel %vm168_vm9, 1, %v2806_v5  ;;  %v264_v25 = vor.u32 %v263_v9, %v262_v4  ;;  %v266_v26 = vshrl.u32 %v3981_v58, %v2896_v63 }
  0x40   :  { %v149_v22 = vadd.s32 %v147_v17, %v145_v14  ;;  %v2953_v27 = vadd.s32 %v166_v51, %v162_v1  ;;  %v171_v28 = vadd.s32 %v169_v24, %v167_v19  ;;  %vm268_vm10 = vcmp.lt.s32.totalorder %v2905_v6, 1 }
  0x41   :  { %vm270_vm11 = vcmp.lt.s32.totalorder %v2905_v6, 3  ;;  %v267_v29 = vor.u32 %v266_v26, %v265_v15  ;;  %vm269_vm12 = vcmp.lt.s32.totalorder %v2905_v6, 2  ;;  %vm271_vm13 = vcmp.lt.s32.totalorder %v2905_v6, 4 }
  0x42   :  { %v150_v38 = vadd.s32 %v149_v22, %v139_v55  ;;  %v120_v30 = vsel %vm114_vm5, %v117_v23, %v119_v31  ;;  %v172_v35 = vadd.s32 %v171_v28, %v161_v62  ;;  %v276_v36 = vsel %vm268_vm10, %v2933_v32, %v2935_v34 }
  0x43   :  { %v277_v40 = vsel %vm271_vm13, %v264_v25, 920167782  ;;  %v280_v46 = vsel %vm268_vm10, %v2935_v34, %v261_v21  ;;  %v285_v37 = vand.u32 65535, %v2877_v39  ;;  %v281_v48 = vsel %vm271_vm13, %v267_v29, 1326507024 }
  0x44   :  { %v2967_v42 = vadd.s32 %v150_v38, %v141_v60  ;;  %v278_v44 = vsel %vm270_vm11, %v261_v21, %v277_v40  ;;  %v173_v23 = vadd.s32 %v172_v35, %v163_v3  ;;  %v286_v50 = vshrl.u32 %v2877_v39, 16 }
  0x45   :  { %v279_v31 = vsel %vm269_vm12, %v276_v36, %v278_v44  ;;  %v174_v53 = vmul.u32 %v2871_v33, %v120_v30  ;;  %v282_v54 = vsel %vm270_vm11, %v264_v25, %v281_v48  ;;  %v252_v59 = vshrl.u32 %v2800_v41, %v2896_v63 }
  0x46   :  { %vm176_vm14 = vc.u32 %v2967_v42, %v2953_v27  ;;  %v309_v55 = vand.u32 65535, %v279_v31  ;;  %v177_v57 = vadd.s32 1, %v173_v23  ;;  %v283_v60 = vsel %vm269_vm12, %v280_v46, %v282_v54 }
  0x47   :  { %v310_v61 = vshrl.u32 %v279_v31, 16  ;;  %v273_v62 = vsel %vm271_vm13, %v261_v21, 2102212464  ;;  %v287_v1 = vand.u32 65535, %v283_v60  ;;  %v288_v33 = vshrl.u32 %v283_v60, 16 }
  0x48   :  { %v720_v2 = vadd.s32 1, %v2885_v52  ;;  %v178_v3 = vsel %vm176_vm14, %v177_v57, %v173_v23  ;;  %v311_v4 = vmul.u32 %v309_v55, %v285_v37  ;;  %v313_v51 = vmul.u32 %v309_v55, %v286_v50 }
  0x49   :  { %v312_v7 = vmul.u32 %v310_v61, %v285_v37  ;;  %v179_v9 = vadd.s32 %v178_v3, %v174_v53  ;;  %v289_v14 = vmul.u32 %v287_v1, %v285_v37  ;;  %v290_v56 = vmul.u32 %v288_v33, %v285_v37 }
  0x4a   :  { %v291_v15 = vmul.u32 %v287_v1, %v286_v50  ;;  %v272_v63 = vsel %vm268_vm10, %v252_v59, %v2933_v32  ;;  %v274_v21 = vsel %vm270_vm11, %v2935_v34, %v273_v62  ;;  %v292_v22 = vmul.u32 %v288_v33, %v286_v50 }
  0x4b   :  { %v315_v17 = vshll.u32 %v312_v7, 16  ;;  %v180_v19 = vadd.s32 536870912, %v179_v9  ;;  %v293_v52 = vshll.u32 %v290_v56, 16  ;;  %v314_v25 = vmul.u32 %v310_v61, %v286_v50 }
  0x4c   :  { %v295_v24 = vshll.u32 %v291_v15, 16  ;;  %v317_v26 = vshll.u32 %v313_v51, 16  ;;  %vm721_vm15 = vcmp.gt.s32.totalorder %v720_v2, 0  ;;  %v316_v32 = vshrl.u32 %v312_v7, 16 }
  0x4d   :  { %v2998_v28 = vshrl.u32 %v180_v19, 30  ;;  %vm297_vm0 = vc.u32 %v289_v14, %v293_v52  ;;  %v299_v38 = vadd.s32 %v293_v52, %v289_v14  ;;  %vm319_vm1 = vc.u32 %v311_v4, %v315_v17 }
  0x4e   :  { %v298_v29 = vsel %vm297_vm0, 1, %v2806_v5  ;;  %v320_v30 = vsel %vm319_vm1, 1, %v2806_v5  ;;  %v321_v35 = vadd.s32 %v315_v17, %v311_v4  ;;  %v294_v34 = vshrl.u32 %v290_v56, 16 }
  0x4f   :  { %v182_v36 = vshll.u32 %v2998_v28, 30  ;;  %v300_v40 = vadd.s32 %v298_v29, %v292_v22  ;;  %vm301_vm2 = vc.u32 %v299_v38, %v295_v24  ;;  %v322_v46 = vadd.s32 %v320_v30, %v314_v25 }
  0x50   :  { %v302_v44 = vsel %vm301_vm2, 1, %v2806_v5  ;;  %vm323_vm3 = vc.u32 %v321_v35, %v317_v26  ;;  %v722_v37 = vsel %vm721_vm15, %v720_v2, 0  ;;  %v296_v31 = vshrl.u32 %v291_v15, 16 }
  0x51   :  { %v183_v23 = vsub.s32 %v179_v9, %v182_v36  ;;  %v304_v48 = vadd.s32 %v302_v44, %v300_v40  ;;  %v324_v50 = vsel %vm323_vm3, 1, %v2806_v5  ;;  %v318_v53 = vshrl.u32 %v313_v51, 16 }
  0x52   :  { %v3006_v54 = vadd.s32 %v321_v35, %v317_v26  ;;  %v326_v55 = vadd.s32 %v324_v50, %v322_v46  ;;  %v724_v60 = vand.u32 31, %v722_v37  ;;  %v275_v61 = vsel %vm269_vm12, %v272_v63, %v274_v21 }
  0x53   :  { %vm184_vm4 = vcmp.lt.s32.totalorder %v183_v23, 0  ;;  %v185_v57 = vsub.s32 0, %v183_v23  ;;  %v305_v59 = vadd.s32 %v304_v48, %v294_v34  ;;  %v710_v2 = vand.u32 2147483647, %v2864_v20 }
  0x54   :  { %v327_v62 = vadd.s32 %v326_v55, %v316_v32  ;;  %v329_v7 = vmul.u32 %v2877_v39, %v275_v61  ;;  %v3016_v51 = vsub.s32 32, %v724_v60  ;;  %v175_v6 = vadd.s32 %v2953_v27, %v2967_v42 }
  0x55   :  { %v186_v1 = vsel %vm184_vm4, %v185_v57, %v183_v23  ;;  %v3010_v33 = vadd.s32 %v305_v59, %v296_v31  ;;  %v717_v56 = vand.u32 8388607, %v710_v2  ;;  %v730_v15 = vshll.u32 %v2801_v43, %v724_v60 }
  0x56   :  { %v187_v3 = vclz %v186_v1  ;;  %v328_v4 = vadd.s32 %v327_v62, %v318_v53  ;;  %v733_v17 = vshll.u32 %v2802_v45, %v724_v60  ;;  %v736_v39 = vshll.u32 %v2803_v47, %v724_v60 }
  0x57   :  { %vm331_vm5 = vc.u32 %v3010_v33, %v3006_v54  ;;  %v731_v22 = vshrl.u32 %v2802_v45, %v3016_v51  ;;  %v734_v52 = vshrl.u32 %v2803_v47, %v3016_v51  ;;  %v737_v25 = vshrl.u32 %v2804_v49, %v3016_v51 }
  0x58   :  { %v2652_v9 = vadd.s32 4294967294, %v187_v3  ;;  %v332_v14 = vadd.s32 1, %v328_v4  ;;  %v3031_v38 = vshrl.u32 %v722_v37, 5  ;;  %v739_v29 = vshll.u32 %v2804_v49, %v724_v60 }
  0x59   :  { %v740_v32 = vshrl.u32 %v3981_v58, %v3016_v51  ;;  %v718_v36 = vor.u32 8388608, %v717_v56  ;;  %v727_v40 = vshll.u32 %v2800_v41, %v724_v60  ;;  %v728_v44 = vshrl.u32 %v2801_v43, %v3016_v51 }
  0x5a   :  { %vm2653_vm6 = vcmp.lt.s32.totalorder %v2652_v9, 0  ;;  %v333_v63 = vsel %vm331_vm5, %v332_v14, %v328_v4  ;;  %v3041_v46 = vor.u32 %v731_v22, %v730_v15  ;;  %v3043_v31 = vor.u32 %v734_v52, %v733_v17 }
  0x5b   :  { %v190_v19 = vsel %vm2653_vm6, 0, %v2652_v9  ;;  %v334_v21 = vadd.s32 %v333_v63, %v329_v7  ;;  %v738_v48 = vor.u32 %v737_v25, %v736_v39  ;;  %v741_v53 = vor.u32 %v740_v32, %v739_v29  ;;  %v74_v9 = vld [vmem:[#allocation8 + $0x28] sm:$0xff] }
  0x5c   :  { %v191_v27 = vsub.s32 32, %v190_v19  ;;  %v192_v42 = vshll.u32 %v183_v23, %v190_v19  ;;  %v195_v24 = vsub.s32 4294967266, %v190_v19  ;;  %vm742_vm7 = vcmp.lt.s32.totalorder %v3031_v38, 1 }
  0x5d   :  { %v335_v26 = vadd.s32 536870912, %v334_v21  ;;  %vm745_vm8 = vcmp.lt.s32.totalorder %v3031_v38, 4  ;;  %v3048_v59 = vshll.u32 %v718_v36, 8  ;;  %v3050_v61 = vor.u32 %v728_v44, %v727_v40 }
  0x5e   :  { %v193_v30 = vshrl.u32 %v175_v6, %v191_v27  ;;  %v196_v35 = vadd.s32 127, %v195_v24  ;;  %vm744_vm9 = vcmp.lt.s32.totalorder %v3031_v38, 3  ;;  %vm743_vm10 = vcmp.lt.s32.totalorder %v3031_v38, 2 }
  0x5f   :  { %v3036_v34 = vshrl.u32 %v335_v26, 30  ;;  %v751_v1 = vsel %vm745_vm8, %v738_v48, 920167782  ;;  %v754_v3 = vsel %vm742_vm7, %v3041_v46, %v3043_v31  ;;  %vm83_vm11 = vcmp.lt.s32.totalorder %v2853_v12, 0 }
  0x60   :  { %v194_v23 = vor.u32 %v193_v30, %v192_v42  ;;  %v197_v37 = vshll.u32 %v196_v35, 23  ;;  %v755_v7 = vsel %vm745_vm8, %v741_v53, 1326507024  ;;  %vm3065_vm13 = vcmp.le.f32.partialorder %v81_v16, 0.7853982  ;;  %v68_v42 = vld [vmem:[#allocation8 + $0x8] sm:$0xff] }
  0x61   :  { %v337_v50 = vshll.u32 %v3036_v34, 30  ;;  %v756_v56 = vsel %vm744_vm9, %v738_v48, %v755_v7  ;;  %v759_v15 = vand.u32 65535, %v3048_v59  ;;  %v750_v17 = vsel %vm742_vm7, %v3050_v61, %v3041_v46 }
  0x62   :  { %v198_v55 = vor.u32 4788187, %v197_v37  ;;  %v201_v57 = vcvt.s32.f32 %v194_v23  ;;  %v752_v39 = vsel %vm744_vm9, %v3043_v31, %v751_v1  ;;  %v757_v16 = vsel %vm743_vm10, %v754_v3, %v756_v56 }
  0x63   :  { %v338_v60 = vsub.s32 %v334_v21, %v337_v50  ;;  %v761_v22 = vand.u32 65535, %v757_v16  ;;  %v762_v52 = vshrl.u32 %v757_v16, 16  ;;  %v701_v27 = vmul.f32 %v699_v8, %v74_v9 }
  0x64   :  { %v199_v62 = vand.u32 2147483647, %v198_v55  ;;  %v753_v26 = vsel %vm743_vm10, %v750_v17, %v752_v39  ;;  %v760_v30 = vshrl.u32 %v3048_v59, 16  ;;  %v330_v36 = vadd.s32 %v3006_v54, %v3010_v33 }
  0x65   :  { %vm339_vm12 = vcmp.lt.s32.totalorder %v338_v60, 0  ;;  %v340_v4 = vsub.s32 0, %v338_v60  ;;  %v3087_v29 = vmul.u32 %v762_v52, %v759_v15  ;;  %v763_v35 = vmul.u32 %v761_v22, %v759_v15 }
  0x66   :  { %v202_v6 = vmul.f32 %v201_v57, %v199_v62  ;;  %v707_v23 = vmul.f32 %v705_v11, %v68_v42  ;;  %v784_v37 = vshrl.u32 %v753_v26, 16  ;;  %v704_v55 = vadd.f32 %v2850_v10, %v701_v27 }
  0x67   :  { %v341_v63 = vsel %vm339_vm12, %v340_v4, %v338_v60  ;;  %v767_v40 = vshll.u32 %v3087_v29, 16  ;;  %v765_v62 = vmul.u32 %v761_v22, %v760_v30  ;;  %v783_v1 = vand.u32 65535, %v753_v26 }
  0x68   :  { %v203_v19 = vxor.u32 2147483648, %v202_v6  ;;  %v342_v21 = vclz %v341_v63  ;;  %v766_v7 = vmul.u32 %v762_v52, %v760_v30  ;;  %v786_v9 = vmul.u32 %v784_v37, %v759_v15 }
  0x69   :  { %vm771_vm15 = vc.u32 %v763_v35, %v767_v40  ;;  %v205_v11 = vsub.s32 4, %v2998_v28  ;;  %v3108_v56 = vadd.f32 %v707_v23, %v704_v55  ;;  %v769_v10 = vshll.u32 %v765_v62, 16 }
  0x6a   :  { %v204_v24 = vsel %vm83_vm11, %v203_v19, %v202_v6  ;;  %v2655_v25 = vadd.s32 4294967294, %v342_v21  ;;  %v773_v17 = vadd.s32 %v767_v40, %v763_v35  ;;  %v787_v39 = vmul.u32 %v783_v1, %v760_v30 }
  0x6b   :  { %v3092_v32 = vsel %vm3065_vm13, %v2853_v12, %v204_v24  ;;  %vm238_vm0 = vcmp.lt.s32.totalorder %v2855_v13, 0  ;;  %v785_v21 = vmul.u32 %v783_v1, %v759_v15  ;;  %v789_v42 = vshll.u32 %v786_v9, 16 }
  0x6c   :  { %v3097_v8 = vmul.f32 %v3092_v32, %v3092_v32  ;;  %vm2656_vm14 = vcmp.lt.s32.totalorder %v2655_v25, 0  ;;  %v206_v24 = vsel %vm83_vm11, %v205_v11, %v2998_v28  ;;  %vm3118_vm1 = vcmp.le.f32.partialorder %v236_v18, 0.7853982 }
  0x6d   :  { %v345_v44 = vsel %vm2656_vm14, 0, %v2655_v25  ;;  %v726_v26 = vshrl.u32 %v2800_v41, %v3016_v51  ;;  %v788_v35 = vmul.u32 %v784_v37, %v760_v30  ;;  %v768_v15 = vshrl.u32 %v3087_v29, 16 }
  0x6e   :  { %v217_v48 = vmul.f32 -0.00019511016, %v3097_v8  ;;  %v346_v50 = vsub.s32 32, %v345_v44  ;;  %v347_v53 = vshll.u32 %v338_v60, %v345_v44  ;;  %v350_v57 = vsub.s32 4294967266, %v345_v44 }
  0x6f   :  { %v210_v3 = vmul.f32 -0.001358992, %v3097_v8  ;;  %v772_v60 = vsel %vm771_vm15, 1, %v2806_v5  ;;  %vm775_vm2 = vc.u32 %v773_v17, %v769_v10  ;;  %v791_v40 = vshll.u32 %v787_v39, 16 }
  0x70   :  { %v218_v54 = vadd.f32 0.008332121, %v217_v48  ;;  %v348_v33 = vshrl.u32 %v330_v36, %v346_v50  ;;  %v351_v4 = vadd.s32 127, %v350_v57  ;;  %v774_v27 = vadd.s32 %v772_v60, %v766_v7 }
  0x71   :  { %v211_v16 = vadd.f32 0.041655596, %v210_v3  ;;  %v747_v28 = vsel %vm745_vm8, %v3043_v31, 2102212464  ;;  %v776_v18 = vsel %vm775_vm2, 1, %v2806_v5  ;;  %vm793_vm3 = vc.u32 %v785_v21, %v789_v42 }
  0x72   :  { %v349_v6 = vor.u32 %v348_v33, %v347_v53  ;;  %v352_v63 = vshll.u32 %v351_v4, 23  ;;  %v219_v19 = vmul.f32 %v218_v54, %v3097_v8  ;;  %v778_v50 = vadd.s32 %v776_v18, %v774_v27 }
  0x73   :  { %v212_v44 = vmul.f32 %v211_v16, %v3097_v8  ;;  %v795_v53 = vadd.s32 %v789_v42, %v785_v21  ;;  %v746_v51 = vsel %vm742_vm7, %v726_v26, %v3050_v61  ;;  %v770_v29 = vshrl.u32 %v765_v62, 16 }
  0x74   :  { %v353_v22 = vor.u32 4788187, %v352_v63  ;;  %v356_v52 = vcvt.s32.f32 %v349_v6  ;;  %v220_v23 = vadd.f32 -0.16666654, %v219_v19  ;;  %v790_v30 = vshrl.u32 %v786_v9, 16 }
  0x75   :  { %v794_v37 = vsel %vm793_vm3, 1, %v2806_v5  ;;  %v779_v57 = vadd.s32 %v778_v50, %v768_v15  ;;  %vm797_vm4 = vc.u32 %v795_v53, %v791_v40  ;;  %v213_v3 = vadd.f32 -0.4999988, %v212_v44 }
  0x76   :  { %v354_v36 = vand.u32 2147483647, %v353_v22  ;;  %v796_v1 = vadd.s32 %v794_v37, %v788_v35  ;;  %v360_v31 = vsub.s32 4, %v3036_v34  ;;  %v748_v54 = vsel %vm744_vm9, %v3041_v46, %v747_v28 }
  0x77   :  { %v798_v33 = vsel %vm797_vm4, 1, %v2806_v5  ;;  %v221_v4 = vmul.f32 %v220_v23, %v3097_v8  ;;  %v792_v62 = vshrl.u32 %v787_v39, 16  ;;  %v780_v11 = vadd.s32 %v779_v57, %v770_v29 }
  0x78   :  { %v357_v48 = vmul.f32 %v356_v52, %v354_v36  ;;  %v800_v7 = vadd.s32 %v798_v33, %v796_v1  ;;  %v799_v6 = vadd.s32 %v795_v53, %v791_v40  ;;  %v868_v60 = vand.u32 2139095040, %v3108_v56 }
  0x79   :  { %v3150_v46 = vsel %vm3065_vm13, 0, %v206_v24  ;;  %v749_v10 = vsel %vm743_vm10, %v746_v51, %v748_v54  ;;  %v214_v39 = vmul.f32 %v213_v3, %v3097_v8  ;;  %v361_v16 = vsel %vm238_vm0, %v360_v31, %v3036_v34 }
  0x7a   :  { %v358_v55 = vxor.u32 2147483648, %v357_v48  ;;  %v801_v17 = vadd.s32 %v800_v7, %v790_v30  ;;  %v869_v52 = vshrl.u32 %v868_v60, 23  ;;  %v222_v14 = vadd.f32 1.0, %v221_v4 }
  0x7b   :  { %v225_v27 = vadd.s32 3, %v3150_v46  ;;  %v803_v42 = vmul.u32 %v3048_v59, %v749_v10  ;;  %vm805_vm5 = vc.u32 %v780_v11, %v799_v6  ;;  %v865_v38 = vand.u32 2147483647, %v3108_v56 }
  0x7c   :  { %v359_v61 = vsel %vm238_vm0, %v358_v55, %v357_v48  ;;  %v802_v22 = vadd.s32 %v801_v17, %v792_v62  ;;  %v2666_v26 = vadd.s32 4294967169, %v869_v52  ;;  %v3165_v8 = vadd.f32 1.0, %v214_v39 }
  0x7d   :  { %v3145_v9 = vsel %vm3118_vm1, %v2855_v13, %v359_v61  ;;  %v3169_v34 = vsel %vm3118_vm1, 0, %v361_v16  ;;  %v3174_v59 = vmul.f32 %v222_v14, %v3092_v32  ;;  %v3176_v44 = vand.u32 3, %v225_v27 }
  0x7e   :  { %v364_v63 = vmul.f32 %v3145_v9, %v3145_v9  ;;  %v806_v24 = vadd.s32 1, %v802_v22  ;;  %v875_v40 = vadd.s32 1, %v2666_v26  ;;  %v872_v28 = vand.u32 8388607, %v865_v38 }
  0x7f   :  { %v380_v25 = vadd.s32 3, %v3169_v34  ;;  %v232_v50 = vxor.u32 2147483648, %v3165_v8  ;;  %v229_v32 = vxor.u32 2147483648, %v3174_v59  ;;  %vm231_vm7 = vcmp.eq.s32.totalorder %v3176_v44, 2 }
  0x80   :  { %v365_v19 = vmul.f32 -0.001358992, %v364_v63  ;;  %v372_v21 = vmul.f32 -0.00019511016, %v364_v63  ;;  %v807_v15 = vsel %vm805_vm5, %v806_v24, %v802_v22  ;;  %vm876_vm6 = vcmp.gt.s32.totalorder %v875_v40, 0 }
  0x81   :  { %v808_v23 = vadd.s32 %v807_v15, %v803_v42  ;;  %v877_v48 = vsel %vm876_vm6, %v875_v40, 0  ;;  %vm228_vm8 = vcmp.eq.s32.totalorder %v3176_v44, 0  ;;  %v873_v37 = vor.u32 8388608, %v872_v28 }
  0x82   :  { %v366_v35 = vadd.f32 0.041655596, %v365_v19  ;;  %v373_v36 = vadd.f32 0.008332121, %v372_v21  ;;  %v879_v29 = vand.u32 31, %v877_v48  ;;  %v1340_v1 = vstv %s3163_s4 }
  0x83   :  { %v809_v18 = vadd.s32 536870912, %v808_v23  ;;  %v3192_v3 = vsel %vm231_vm7, %v232_v50, %v3174_v59  ;;  %v3194_v33 = vand.u32 3, %v380_v25  ;;  %v3199_v4 = vsel %vm228_vm8, %v3165_v8, %v229_v32 }
  0x84   :  { %v367_v53 = vmul.f32 %v366_v35, %v364_v63  ;;  %v374_v51 = vmul.f32 %v373_v36, %v364_v63  ;;  %v880_v55 = vsub.s32 32, %v879_v29  ;;  %v804_v61 = vadd.s32 %v799_v6, %v780_v11 }
  0x85   :  { %v3184_v30 = vshrl.u32 %v809_v18, 30  ;;  %v1343_v7 = vstv %s3171_s5  ;;  %v882_v60 = vshll.u32 %v2800_v41, %v879_v29  ;;  %v3204_v17 = vshll.u32 %v873_v37, 8 }
  0x86   :  { %v368_v31 = vadd.f32 -0.4999988, %v367_v53  ;;  %v375_v54 = vadd.f32 -0.16666654, %v374_v51  ;;  %v883_v10 = vshrl.u32 %v2801_v43, %v880_v55  ;;  %v1341_v39 = vmul.f32 %v1340_v1, %v2844_v0 }
  0x87   :  { %v811_v57 = vshll.u32 %v3184_v30, 30  ;;  %v885_v19 = vshll.u32 %v2801_v43, %v879_v29  ;;  %v886_v21 = vshrl.u32 %v2802_v45, %v880_v55  ;;  %v3211_v6 = vshrl.u32 %v877_v48, 5 }
  0x88   :  { %v369_v22 = vmul.f32 %v368_v31, %v364_v63  ;;  %v376_v11 = vmul.f32 %v375_v54, %v364_v63  ;;  %v891_v52 = vshll.u32 %v2803_v47, %v879_v29  ;;  %v888_v27 = vshll.u32 %v2802_v45, %v879_v29 }
  0x89   :  { %v812_v62 = vsub.s32 %v808_v23, %v811_v57  ;;  %v889_v42 = vshrl.u32 %v2803_v47, %v880_v55  ;;  %v892_v0 = vshrl.u32 %v2804_v49, %v880_v55  ;;  %vm712_vm10 = vcmp.lt.s32.totalorder %v2864_v20, 0 }
  0x8a   :  { %v884_v26 = vor.u32 %v883_v10, %v882_v60  ;;  %v914_v35 = vand.u32 65535, %v3204_v17  ;;  %v3221_v36 = vadd.f32 %v1343_v7, %v1341_v39  ;;  %v887_v63 = vor.u32 %v886_v21, %v885_v19 }
  0x8b   :  { %vm813_vm9 = vcmp.lt.s32.totalorder %v812_v62, 0  ;;  %v814_v16 = vsub.s32 0, %v812_v62  ;;  %v893_v15 = vor.u32 %v892_v0, %v891_v52  ;;  %v894_v40 = vshll.u32 %v2804_v49, %v879_v29 }
  0x8c   :  { %v895_v23 = vshrl.u32 %v3981_v58, %v880_v55  ;;  %vm897_vm11 = vcmp.lt.s32.totalorder %v3211_v6, 1  ;;  %vm900_vm12 = vcmp.lt.s32.totalorder %v3211_v6, 4  ;;  %v915_v25 = vshrl.u32 %v3204_v17, 16 }
  0x8d   :  { %v815_v14 = vsel %vm813_vm9, %v814_v16, %v812_v62  ;;  %v3228_v18 = vadd.f32 1.0, %v369_v22  ;;  %v377_v48 = vadd.f32 1.0, %v376_v11  ;;  %v890_v53 = vor.u32 %v889_v42, %v888_v27 }
  0x8e   :  { %v816_v24 = vclz %v815_v14  ;;  %v1346_v51 = vand.u32 2147483647, %v3221_v36  ;;  %v834_v37 = vsub.s32 4, %v3184_v30  ;;  %vm898_vm14 = vcmp.lt.s32.totalorder %v3211_v6, 2 }
  0x8f   :  { %vm899_vm15 = vcmp.lt.s32.totalorder %v3211_v6, 3  ;;  %v896_v57 = vor.u32 %v895_v23, %v894_v40  ;;  %v905_v31 = vsel %vm897_vm11, %v884_v26, %v887_v63  ;;  %v906_v54 = vsel %vm900_vm12, %v893_v15, 920167782 }
  0x90   :  { %v2664_v28 = vadd.s32 4294967294, %v816_v24  ;;  %v1349_v16 = vand.u32 2139095040, %v3221_v36  ;;  %v3240_v19 = vmul.f32 %v377_v48, %v3145_v9  ;;  %v387_v21 = vxor.u32 2147483648, %v3228_v18 }
  0x91   :  { %v881_v22 = vshrl.u32 %v2800_v41, %v880_v55  ;;  %v907_v11 = vsel %vm899_vm15, %v890_v53, %v906_v54  ;;  %v3253_v9 = vsel %vm712_vm10, %v834_v37, %v3184_v30  ;;  %v910_v42 = vsel %vm900_vm12, %v896_v57, 1326507024 }
  0x92   :  { %vm2665_vm13 = vcmp.lt.s32.totalorder %v2664_v28, 0  ;;  %v908_v27 = vsel %vm898_vm14, %v905_v31, %v907_v11  ;;  %vm3259_vm0 = vcmp.le.f32.partialorder %v710_v2, 0.7853982  ;;  %v902_v23 = vsel %vm900_vm12, %v890_v53, 2102212464 }
  0x93   :  { %v819_v29 = vsel %vm2665_vm13, 0, %v2664_v28  ;;  %v938_v55 = vand.u32 65535, %v908_v27  ;;  %v939_v0 = vshrl.u32 %v908_v27, 16  ;;  %v911_v30 = vsel %vm899_vm15, %v893_v15, %v910_v42 }
  0x94   :  { %v820_v60 = vsub.s32 32, %v819_v29  ;;  %v821_v10 = vshll.u32 %v812_v62, %v819_v29  ;;  %v824_v39 = vsub.s32 4294967266, %v819_v29  ;;  %v909_v62 = vsel %vm897_vm11, %v887_v63, %v890_v53 }
  0x95   :  { %v912_v28 = vsel %vm898_vm14, %v909_v62, %v911_v30  ;;  %v940_v48 = vmul.u32 %v938_v55, %v914_v35  ;;  %v941_v37 = vmul.u32 %v939_v0, %v914_v35  ;;  %v942_v29 = vmul.u32 %v938_v55, %v915_v25 }
  0x96   :  { %v822_v52 = vshrl.u32 %v804_v61, %v820_v60  ;;  %v825_v14 = vadd.s32 127, %v824_v39  ;;  %v916_v2 = vand.u32 65535, %v912_v28  ;;  %v917_v54 = vshrl.u32 %v912_v28, 16 }
  0x97   :  { %v901_v60 = vsel %vm897_vm11, %v881_v22, %v884_v26  ;;  %v944_v39 = vshll.u32 %v941_v37, 16  ;;  %v946_v11 = vshll.u32 %v942_v29, 16  ;;  %vm227_vm1 = vcmp.lt.s32.totalorder %v3176_v44, 2 }
  0x98   :  { %v823_v24 = vor.u32 %v822_v52, %v821_v10  ;;  %v826_v40 = vshll.u32 %v825_v14, 23  ;;  %v943_v10 = vmul.u32 %v939_v0, %v915_v25  ;;  %v918_v15 = vmul.u32 %v916_v2, %v914_v35 }
  0x99   :  { %v919_v52 = vmul.u32 %v917_v54, %v914_v35  ;;  %v920_v14 = vmul.u32 %v916_v2, %v915_v25  ;;  %v903_v27 = vsel %vm899_vm15, %v887_v63, %v902_v23  ;;  %vm948_vm2 = vc.u32 %v940_v48, %v944_v39 }
  0x9a   :  { %v827_v57 = vor.u32 4788187, %v826_v40  ;;  %v830_v31 = vcvt.s32.f32 %v823_v24  ;;  %v950_v62 = vadd.s32 %v944_v39, %v940_v48  ;;  %v1350_v42 = vshrl.u32 %v1349_v16, 23 }
  0x9b   :  { %vm386_vm3 = vcmp.eq.s32.totalorder %v3194_v33, 2  ;;  %v921_v24 = vmul.u32 %v917_v54, %v915_v25  ;;  %v922_v26 = vshll.u32 %v919_v52, 16  ;;  %v924_v22 = vshll.u32 %v920_v14, 16 }
  0x9c   :  { %v828_v53 = vand.u32 2147483647, %v827_v57  ;;  %vm383_vm4 = vcmp.eq.s32.totalorder %v3194_v33, 0  ;;  %v945_v0 = vshrl.u32 %v941_v37, 16  ;;  %v947_v40 = vshrl.u32 %v942_v29, 16 }
  0x9d   :  { %v949_v30 = vsel %vm948_vm2, 1, %v2806_v5  ;;  %vm952_vm5 = vc.u32 %v950_v62, %v946_v11  ;;  %vm224_vm6 = vweird.f32 %v2853_v12  ;;  %vm926_vm7 = vc.u32 %v918_v15, %v922_v26 }
  0x9e   :  { %v831_v55 = vmul.f32 %v830_v31, %v828_v53  ;;  %v928_v63 = vadd.s32 %v922_v26, %v918_v15  ;;  %v951_v23 = vadd.s32 %v949_v30, %v943_v10  ;;  %v923_v16 = vshrl.u32 %v919_v52, 16 }
  0x9f   :  { %v927_v28 = vsel %vm926_vm7, 1, %v2806_v5  ;;  %v953_v25 = vsel %vm952_vm5, 1, %v2806_v5  ;;  %v2675_v48 = vadd.s32 4294967169, %v1350_v42  ;;  %vm382_vm8 = vcmp.lt.s32.totalorder %v3194_v33, 2 }
  0xa0   :  { %v832_v35 = vxor.u32 2147483648, %v831_v55  ;;  %v929_v29 = vadd.s32 %v927_v28, %v921_v24  ;;  %vm930_vm9 = vc.u32 %v928_v63, %v924_v22  ;;  %v955_v57 = vadd.s32 %v953_v25, %v951_v23 }
  0xa1   :  { %v904_v2 = vsel %vm898_vm14, %v901_v60, %v903_v27  ;;  %v931_v54 = vsel %vm930_vm9, 1, %v2806_v5  ;;  %v1356_v10 = vadd.s32 1, %v2675_v48  ;;  %v925_v53 = vshrl.u32 %v920_v14, 16 }
  0xa2   :  { %v833_v37 = vsel %vm712_vm10, %v832_v35, %v831_v55  ;;  %v933_v15 = vadd.s32 %v931_v54, %v929_v29  ;;  %v956_v52 = vadd.s32 %v955_v57, %v945_v0  ;;  %v384_v42 = vxor.u32 2147483648, %v3240_v19  ;;  %v2712_v0 = vld [vmem:[#allocation8 + $0x18] sm:$0xff] }
  0xa3   :  { %v836_v31 = vsel %vm3259_vm0, %v2864_v20, %v833_v37  ;;  %v3293_v55 = vsel %vm3259_vm0, 0, %v3253_v9  ;;  %v3295_v24 = vadd.s32 %v950_v62, %v946_v11  ;;  %vm1357_vm10 = vcmp.gt.s32.totalorder %v1356_v10, 0 }
  0xa4   :  { %v838_v39 = vmul.f32 %v836_v31, %v836_v31  ;;  %v934_v27 = vadd.s32 %v933_v15, %v923_v16  ;;  %v957_v26 = vadd.s32 %v956_v52, %v947_v40  ;;  %v234_v14 = vsel %vm227_vm1, %v3199_v4, %v3192_v3 }
  0xa5   :  { %v958_v22 = vmul.u32 %v3204_v17, %v904_v2  ;;  %v1342_v30 = vmul.f32 %v2712_v0, %v1340_v1  ;;  %v1358_v61 = vsel %vm1357_vm10, %v1356_v10, 0  ;;  %v388_v40 = vsel %vm386_vm3, %v387_v21, %v3240_v19 }
  0xa6   :  { %v839_v6 = vmul.f32 -0.001358992, %v838_v39  ;;  %v846_v60 = vmul.f32 -0.00019511016, %v838_v39  ;;  %v3304_v11 = vadd.s32 %v934_v27, %v925_v53  ;;  %v961_v62 = vadd.s32 1, %v957_v26 }
  0xa7   :  { %v854_v44 = vadd.s32 3, %v3293_v55  ;;  %v1353_v3 = vand.u32 8388607, %v1346_v51  ;;  %v1360_v4 = vand.u32 31, %v1358_v61  ;;  %v385_v1 = vsel %vm383_vm4, %v3228_v18, %v384_v42 }
  0xa8   :  { %v840_v9 = vadd.f32 0.041655596, %v839_v6  ;;  %v847_v35 = vadd.f32 0.008332121, %v846_v60  ;;  %vm960_vm11 = vc.u32 %v3304_v11, %v3295_v24  ;;  %v3323_v23 = vsel %vm224_vm6, nan, %v234_v14 }
  0xa9   :  { %v962_v16 = vsel %vm960_vm11, %v961_v62, %v957_v26  ;;  %v1361_v28 = vsub.s32 32, %v1360_v4  ;;  %v3327_v29 = vadd.f32 %v1343_v7, %v1342_v30  ;;  %v3331_v57 = vsel %vm382_vm8, %v385_v1, %v388_v40 }
  0xaa   :  { %v841_v17 = vmul.f32 %v840_v9, %v838_v39  ;;  %v848_v63 = vmul.f32 %v847_v35, %v838_v39  ;;  %v963_v37 = vadd.s32 %v962_v16, %v958_v22  ;;  %v3333_v2 = vand.u32 3, %v854_v44 }
  0xab   :  { %v1354_v54 = vor.u32 8388608, %v1353_v3  ;;  %v3335_v10 = vshrl.u32 %v1358_v61, 5  ;;  %v1363_v6 = vshll.u32 %v2800_v41, %v1360_v4  ;;  %v1366_v60 = vshll.u32 %v2801_v43, %v1360_v4 }
  0xac   :  { %v842_v25 = vadd.f32 -0.4999988, %v841_v17  ;;  %v849_v48 = vadd.f32 -0.16666654, %v848_v63  ;;  %v964_v52 = vadd.s32 536870912, %v963_v37  ;;  %v1369_v27 = vshll.u32 %v2802_v45, %v1360_v4 }
  0xad   :  { %v1372_v7 = vshll.u32 %v2803_v47, %v1360_v4  ;;  %v1373_v33 = vshrl.u32 %v2804_v49, %v1361_v28  ;;  %v1364_v22 = vshrl.u32 %v2801_v43, %v1361_v28  ;;  %v1367_v0 = vshrl.u32 %v2802_v45, %v1361_v28 }
  0xae   :  { %v843_v53 = vmul.f32 %v842_v25, %v838_v39  ;;  %v850_v15 = vmul.f32 %v849_v48, %v838_v39  ;;  %v965_v14 = vshrl.u32 %v964_v52, 30  ;;  %v1370_v39 = vshrl.u32 %v2803_v47, %v1361_v28 }
  0xaf   :  { %v1375_v61 = vshll.u32 %v2804_v49, %v1360_v4  ;;  %v1376_v9 = vshrl.u32 %v3981_v58, %v1361_v28  ;;  %vm856_vm12 = vcmp.lt.s32.totalorder %v3333_v2, 2  ;;  %vm857_vm13 = vcmp.eq.s32.totalorder %v3333_v2, 0 }
  0xb0   :  { %v851_v26 = vadd.f32 1.0, %v850_v15  ;;  %v3344_v30 = vadd.f32 1.0, %v843_v53  ;;  %v966_v62 = vshll.u32 %v965_v14, 30  ;;  %vm860_vm14 = vcmp.eq.s32.totalorder %v3333_v2, 2 }
  0xb1   :  { %vm867_vm15 = vcmp.lt.s32.totalorder %v3108_v56, 0  ;;  %v1374_v40 = vor.u32 %v1373_v33, %v1372_v7  ;;  %v3355_v44 = vshll.u32 %v1354_v54, 8  ;;  %v1504_v3 = vand.u32 2139095040, %v3327_v29 }
  0xb2   :  { %v3349_v35 = vmul.f32 %v851_v26, %v836_v31  ;;  %v3358_v1 = vsub.s32 %v963_v37, %v966_v62  ;;  %v1365_v4 = vor.u32 %v1364_v22, %v1363_v6  ;;  %v1368_v17 = vor.u32 %v1367_v0, %v1366_v60 }
  0xb3   :  { %v3980_v31 = vand.u32 2147483647, %v3327_v29  ;;  %vm853_vm0 = vweird.f32 %v2864_v20  ;;  %v861_v63 = vxor.u32 2147483648, %v3344_v30  ;;  %v1371_v16 = vor.u32 %v1370_v39, %v1369_v27 }
  0xb4   :  { %v1377_v25 = vor.u32 %v1376_v9, %v1375_v61  ;;  %vm1381_vm1 = vcmp.lt.s32.totalorder %v3335_v10, 4  ;;  %v858_v48 = vxor.u32 2147483648, %v3349_v35  ;;  %vm968_vm2 = vcmp.lt.s32.totalorder %v3358_v1, 0 }
  0xb5   :  { %v969_v54 = vsub.s32 0, %v3358_v1  ;;  %vm1378_vm3 = vcmp.lt.s32.totalorder %v3335_v10, 1  ;;  %vm3370_vm4 = vcmp.le.f32.partialorder %v865_v38, 0.7853982  ;;  %vm1380_vm5 = vcmp.lt.s32.totalorder %v3335_v10, 3 }
  0xb6   :  { %v1387_v53 = vsel %vm1381_vm1, %v1374_v40, 920167782  ;;  %v3378_v15 = vand.u32 65535, %v3355_v44  ;;  %v1505_v52 = vshrl.u32 %v1504_v3, 23  ;;  %v989_v60 = vsub.s32 4, %v965_v14 }
  0xb7   :  { %v970_v6 = vsel %vm968_vm2, %v969_v54, %v3358_v1  ;;  %v1362_v27 = vshrl.u32 %v2800_v41, %v1361_v28  ;;  %vm1379_vm7 = vcmp.lt.s32.totalorder %v3335_v10, 2  ;;  %v862_v38 = vsel %vm860_vm14, %v861_v63, %v3349_v35 }
  0xb8   :  { %v971_v7 = vclz %v970_v6  ;;  %v1390_v33 = vsel %vm1378_vm3, %v1368_v17, %v1371_v16  ;;  %v1391_v26 = vsel %vm1381_vm1, %v1377_v25, 1326507024  ;;  %v859_v22 = vsel %vm857_vm13, %v3344_v30, %v858_v48 }
  0xb9   :  { %v1386_v28 = vsel %vm1378_vm3, %v1365_v4, %v1368_v17  ;;  %v1388_v0 = vsel %vm1380_vm5, %v1371_v16, %v1387_v53  ;;  %v1392_v39 = vsel %vm1380_vm5, %v1374_v40, %v1391_v26  ;;  %v1383_v9 = vsel %vm1381_vm1, %v1371_v16, 2102212464 }
  0xba   :  { %v2667_v61 = vadd.s32 4294967294, %v971_v7  ;;  %v1396_v62 = vshrl.u32 %v3355_v44, 16  ;;  %v2678_v3 = vadd.s32 4294967169, %v1505_v52  ;;  %v959_v25 = vadd.s32 %v3295_v24, %v3304_v11 }
  0xbb   :  { %v990_v54 = vsel %vm867_vm15, %v989_v60, %v965_v14  ;;  %v1393_v6 = vsel %vm1379_vm7, %v1390_v33, %v1392_v39  ;;  %v3410_v53 = vand.u32 8388607, %v3980_v31  ;;  %v863_v40 = vsel %vm856_vm12, %v859_v22, %v862_v38 }
  0xbc   :  { %vm2668_vm8 = vcmp.lt.s32.totalorder %v2667_v61, 0  ;;  %v1382_v16 = vsel %vm1378_vm3, %v1362_v27, %v1365_v4  ;;  %v1389_v24 = vsel %vm1379_vm7, %v1386_v28, %v1388_v0  ;;  %v1164_v14 = vand.u32 3, %v3293_v55 }
  0xbd   :  { %v974_v11 = vsel %vm2668_vm8, 0, %v2667_v61  ;;  %v1384_v52 = vsel %vm1380_vm5, %v1368_v17, %v1383_v9  ;;  %v1397_v60 = vand.u32 65535, %v1393_v6  ;;  %v1398_v2 = vshrl.u32 %v1393_v6, 16 }
  0xbe   :  { %v975_v7 = vsub.s32 32, %v974_v11  ;;  %v976_v33 = vshll.u32 %v3358_v1, %v974_v11  ;;  %v979_v26 = vsub.s32 4294967266, %v974_v11  ;;  %v3424_v38 = vsel %vm853_vm0, nan, %v863_v40 }
  0xbf   :  { %v3428_v4 = vsel %vm3370_vm4, 0, %v990_v54  ;;  %vm1166_vm9 = vcmp.eq.s32.totalorder %v1164_v14, 0  ;;  %v1420_v27 = vshrl.u32 %v1389_v24, 16  ;;  %vm1165_vm10 = vcmp.lt.s32.totalorder %v1164_v14, 2 }
  0xc0   :  { %v977_v55 = vshrl.u32 %v959_v25, %v975_v7  ;;  %v980_v22 = vadd.s32 127, %v979_v26  ;;  %v1168_v17 = vsel %vm1166_vm9, %v3344_v30, %v858_v48  ;;  %vm1169_vm11 = vcmp.eq.s32.totalorder %v1164_v14, 2 }
  0xc1   :  { %v3433_v1 = vsel %vm1379_vm7, %v1382_v16, %v1384_v52  ;;  %v1399_v28 = vmul.u32 %v1397_v60, %v3378_v15  ;;  %v1419_v0 = vand.u32 65535, %v1389_v24  ;;  %v1171_v9 = vsel %vm1169_vm11, %v861_v63, %v3349_v35 }
  0xc2   :  { %v978_v39 = vor.u32 %v977_v55, %v976_v33  ;;  %v981_v61 = vshll.u32 %v980_v22, 23  ;;  %v1400_v54 = vmul.u32 %v1398_v2, %v3378_v15  ;;  %v1172_v6 = vsel %vm1165_vm10, %v1168_v17, %v1171_v9 }
  0xc3   :  { %v1401_v25 = vmul.u32 %v1397_v60, %v1396_v62  ;;  %v1402_v40 = vmul.u32 %v1398_v2, %v1396_v62  ;;  %v1422_v11 = vmul.u32 %v1420_v27, %v3378_v15  ;;  %vm379_vm12 = vweird.f32 %v2855_v13 }
  0xc4   :  { %v982_v30 = vor.u32 4788187, %v981_v61  ;;  %v985_v10 = vcvt.s32.f32 %v978_v39  ;;  %v3442_v48 = vsel %vm853_vm0, nan, %v1172_v6  ;;  %v1403_v16 = vshll.u32 %v1400_v54, 16 }
  0xc5   :  { %v1334_v24 = vmul.f32 %v3424_v38, %v3323_v23  ;;  %v1336_v35 = vmul.f32 0.0, %v3442_v48  ;;  %v1423_v63 = vmul.u32 %v1419_v0, %v1396_v62  ;;  %v1511_v14 = vadd.s32 1, %v2678_v3 }
  0xc6   :  { %v983_v52 = vand.u32 2147483647, %v982_v30  ;;  %v1405_v60 = vshll.u32 %v1401_v25, 16  ;;  %vm1407_vm13 = vc.u32 %v1399_v28, %v1403_v16  ;;  %v1421_v7 = vmul.u32 %v1419_v0, %v3378_v15 }
  0xc7   :  { %v1009_v33 = vadd.s32 3, %v3428_v4  ;;  %v3449_v26 = vadd.f32 %v1336_v35, %v1334_v24  ;;  %v1408_v20 = vsel %vm1407_vm13, 1, %v2806_v5  ;;  %v1409_v2 = vadd.s32 %v1403_v16, %v1399_v28 }
  0xc8   :  { %v986_v55 = vmul.f32 %v985_v10, %v983_v52  ;;  %v1410_v22 = vadd.s32 %v1408_v20, %v1402_v40  ;;  %v1424_v17 = vmul.u32 %v1420_v27, %v1396_v62  ;;  %v1425_v39 = vshll.u32 %v1422_v11, 16 }
  0xc9   :  { %v1404_v61 = vshrl.u32 %v1400_v54, 16  ;;  %v1406_v9 = vshrl.u32 %v1401_v25, 16  ;;  %vm1411_vm14 = vc.u32 %v1409_v2, %v1405_v60  ;;  %v1427_v3 = vshll.u32 %v1423_v63, 16 }
  0xca   :  { %v987_v6 = vxor.u32 2147483648, %v986_v55  ;;  %v1412_v30 = vsel %vm1411_vm14, 1, %v2806_v5  ;;  %vm1429_vm0 = vc.u32 %v1421_v7, %v1425_v39  ;;  %v1431_v15 = vadd.s32 %v1425_v39, %v1421_v7 }
  0xcb   :  { %v1414_v0 = vadd.s32 %v1412_v30, %v1410_v22  ;;  %v1426_v31 = vshrl.u32 %v1422_v11, 16  ;;  %v1430_v24 = vsel %vm1429_vm0, 1, %v2806_v5  ;;  %vm1512_vm1 = vcmp.gt.s32.totalorder %v1511_v14, 0 }
  0xcc   :  { %v988_v28 = vsel %vm867_vm15, %v987_v6, %v986_v55  ;;  %v1432_v40 = vadd.s32 %v1430_v24, %v1424_v17  ;;  %vm1433_vm2 = vc.u32 %v1431_v15, %v1427_v3  ;;  %v3456_v62 = vadd.s32 %v1431_v15, %v1427_v3 }
  0xcd   :  { %v3461_v27 = vsel %vm3370_vm4, %v3108_v56, %v988_v28  ;;  %v1415_v54 = vadd.s32 %v1414_v0, %v1404_v61  ;;  %v1434_v25 = vsel %vm1433_vm2, 1, %v2806_v5  ;;  %v1513_v10 = vsel %vm1512_vm1, %v1511_v14, 0 }
  0xce   :  { %v993_v11 = vmul.f32 %v3461_v27, %v3461_v27  ;;  %v1428_v16 = vshrl.u32 %v1423_v63, 16  ;;  %v1436_v35 = vadd.s32 %v1434_v25, %v1432_v40  ;;  %v1515_v52 = vand.u32 31, %v1513_v10 }
  0xcf   :  { %v3469_v60 = vsel %vm379_vm12, nan, %v3331_v57  ;;  %v3472_v7 = vand.u32 3, %v3150_v46  ;;  %v3474_v37 = vadd.s32 %v1415_v54, %v1406_v9  ;;  %v1439_v20 = vmul.u32 %v3355_v44, %v3433_v1 }
  0xd0   :  { %v994_v14 = vmul.f32 -0.001358992, %v993_v11  ;;  %v1001_v2 = vmul.f32 -0.00019511016, %v993_v11  ;;  %v1437_v55 = vadd.s32 %v1436_v35, %v1426_v31  ;;  %v3478_v22 = vsub.s32 32, %v1515_v52 }
  0xd1   :  { %v3480_v63 = vand.u32 3, %v1009_v33  ;;  %vm1441_vm15 = vc.u32 %v3474_v37, %v3456_v62  ;;  %v1509_v57 = vor.u32 8388608, %v3410_v53  ;;  %v1518_v46 = vshll.u32 %v2800_v41, %v1515_v52 }
  0xd2   :  { %v995_v17 = vadd.f32 0.041655596, %v994_v14  ;;  %v1002_v39 = vadd.f32 0.008332121, %v1001_v2  ;;  %v1438_v61 = vadd.s32 %v1437_v55, %v1428_v16  ;;  %v1521_v9 = vshll.u32 %v2801_v43, %v1515_v52 }
  0xd3   :  { %v1519_v44 = vshrl.u32 %v2801_v43, %v3478_v22  ;;  %v1522_v31 = vshrl.u32 %v2802_v45, %v3478_v22  ;;  %v1524_v1 = vshll.u32 %v2802_v45, %v1515_v52  ;;  %v1525_v33 = vshrl.u32 %v2803_v47, %v3478_v22 }
  0xd4   :  { %v996_v3 = vmul.f32 %v995_v17, %v993_v11  ;;  %v1003_v53 = vmul.f32 %v1002_v39, %v993_v11  ;;  %v1442_v6 = vadd.s32 1, %v1438_v61  ;;  %v1527_v30 = vshll.u32 %v2803_v47, %v1515_v52 }
  0xd5   :  { %vm1015_vm3 = vcmp.eq.s32.totalorder %v3480_v63, 2  ;;  %v1318_v15 = vand.u32 3, %v3428_v4  ;;  %v3497_v0 = vshrl.u32 %v1513_v10, 5  ;;  %v1528_v24 = vshrl.u32 %v2804_v49, %v3478_v22 }
  0xd6   :  { %v997_v28 = vadd.f32 -0.4999988, %v996_v3  ;;  %v1004_v40 = vadd.f32 -0.16666654, %v1003_v53  ;;  %vm1011_vm4 = vcmp.lt.s32.totalorder %v3480_v63, 2  ;;  %v1443_v54 = vsel %vm1441_vm15, %v1442_v6, %v1438_v61 }
  0xd7   :  { %v3505_v25 = vor.u32 %v1519_v44, %v1518_v46  ;;  %vm1008_vm5 = vweird.f32 %v3108_v56  ;;  %v1444_v16 = vadd.s32 %v1443_v54, %v1439_v20  ;;  %v1529_v35 = vor.u32 %v1528_v24, %v1527_v30 }
  0xd8   :  { %v1530_v4 = vshll.u32 %v2804_v49, %v1515_v52  ;;  %v1531_v10 = vshrl.u32 %v3981_v58, %v3478_v22  ;;  %v998_v14 = vmul.f32 %v997_v28, %v993_v11  ;;  %v1005_v2 = vmul.f32 %v1004_v40, %v993_v11 }
  0xd9   :  { %v3511_v55 = vor.u32 %v1522_v31, %v1521_v9  ;;  %v1526_v17 = vor.u32 %v1525_v33, %v1524_v1  ;;  %vm1323_vm7 = vcmp.eq.s32.totalorder %v1318_v15, 2  ;;  %v1445_v39 = vadd.s32 536870912, %v1444_v16 }
  0xda   :  { %vm1533_vm8 = vcmp.lt.s32.totalorder %v3497_v0, 1  ;;  %vm1535_vm9 = vcmp.lt.s32.totalorder %v3497_v0, 3  ;;  %v999_v46 = vadd.f32 1.0, %v998_v14  ;;  %v1006_v61 = vadd.f32 1.0, %v1005_v2 }
  0xdb   :  { %vm1536_vm10 = vcmp.lt.s32.totalorder %v3497_v0, 4  ;;  %v3516_v20 = vshll.u32 %v1509_v57, 8  ;;  %v3520_v52 = vshrl.u32 %v1445_v39, 30  ;;  %v1532_v11 = vor.u32 %v1531_v10, %v1530_v4 }
  0xdc   :  { %vm1534_vm11 = vcmp.lt.s32.totalorder %v3497_v0, 2  ;;  %v1542_v9 = vsel %vm1536_vm10, %v1529_v35, 920167782  ;;  %v1007_v44 = vmul.f32 %v1006_v61, %v3461_v27  ;;  %v1016_v31 = vxor.u32 2147483648, %v999_v46 }
  0xdd   :  { %v1541_v1 = vsel %vm1533_vm8, %v3505_v25, %v3511_v55  ;;  %v1543_v57 = vsel %vm1535_vm9, %v1526_v17, %v1542_v9  ;;  %vm1012_vm13 = vcmp.eq.s32.totalorder %v3480_v63, 0  ;;  %vm1319_vm14 = vcmp.lt.s32.totalorder %v1318_v15, 2 }
  0xde   :  { %vm1320_vm0 = vcmp.eq.s32.totalorder %v1318_v15, 0  ;;  %v1447_v33 = vshll.u32 %v3520_v52, 30  ;;  %v1013_v3 = vxor.u32 2147483648, %v1007_v44  ;;  %v1017_v53 = vsel %vm1015_vm3, %v1016_v31, %v1007_v44 }
  0xdf   :  { %v1325_v27 = vsel %vm1323_vm7, %v1016_v31, %v1007_v44  ;;  %v1550_v6 = vand.u32 65535, %v3516_v20  ;;  %v1544_v24 = vsel %vm1534_vm11, %v1541_v1, %v1543_v57  ;;  %v1545_v28 = vsel %vm1533_vm8, %v3511_v55, %v1526_v17 }
  0xe0   :  { %v3538_v30 = vsub.s32 %v1444_v16, %v1447_v33  ;;  %v1546_v40 = vsel %vm1536_vm10, %v1532_v11, 1326507024  ;;  %v1014_v54 = vsel %vm1012_vm13, %v999_v46, %v1013_v3  ;;  %v1322_v4 = vsel %vm1320_vm0, %v999_v46, %v1013_v3 }
  0xe1   :  { %v1547_v10 = vsel %vm1535_vm9, %v1529_v35, %v1546_v40  ;;  %v1551_v14 = vshrl.u32 %v3516_v20, 16  ;;  %v1018_v16 = vsel %vm1011_vm4, %v1014_v54, %v1017_v53  ;;  %v1326_v2 = vsel %vm1319_vm14, %v1322_v4, %v1325_v27 }
  0xe2   :  { %vm1449_vm1 = vcmp.lt.s32.totalorder %v3538_v30, 0  ;;  %v1450_v39 = vsub.s32 0, %v3538_v30  ;;  %v3557_v61 = vsel %vm1008_vm5, nan, %v1018_v16  ;;  %v3561_v46 = vsel %vm1008_vm5, nan, %v1326_v2 }
  0xe3   :  { %v1548_v35 = vsel %vm1534_vm11, %v1545_v28, %v1547_v10  ;;  %v1575_v11 = vshrl.u32 %v1544_v24, 16  ;;  %v3566_v63 = vand.u32 3, %v3169_v34  ;;  %v1335_v15 = vmul.f32 %v3557_v61, %v3469_v60  ;;  %v2713_v10 = vld [vmem:[#allocation8 + $0x20] sm:$0xff] }
  0xe4   :  { %v1337_v9 = vmul.f32 0.0, %v3561_v46  ;;  %v1976_v44 = vstv %s3518_s6  ;;  %v1451_v31 = vsel %vm1449_vm1, %v1450_v39, %v3538_v30  ;;  %v1517_v56 = vshrl.u32 %v2800_v41, %v3478_v22 }
  0xe5   :  { %v1552_v1 = vand.u32 65535, %v1548_v35  ;;  %v1553_v57 = vshrl.u32 %v1548_v35, 16  ;;  %v1452_v3 = vclz %v1451_v31  ;;  %v1538_v34 = vsel %vm1536_vm10, %v1526_v17, 2102212464 }
  0xe6   :  { %v3575_v33 = vadd.f32 %v1337_v9, %v1335_v15  ;;  %v1574_v53 = vand.u32 65535, %v1544_v24  ;;  %v3579_v54 = vmul.u32 %v1575_v11, %v1550_v6  ;;  %vm1348_vm2 = vcmp.lt.s32.totalorder %v3221_v36, 0 }
  0xe7   :  { %v1554_v27 = vmul.u32 %v1552_v1, %v1550_v6  ;;  %v1555_v28 = vmul.u32 %v1553_v57, %v1550_v6  ;;  %v1556_v40 = vmul.u32 %v1552_v1, %v1551_v14  ;;  %v1440_v4 = vadd.s32 %v3456_v62, %v3474_v37 }
  0xe8   :  { %v2676_v22 = vadd.s32 4294967294, %v1452_v3  ;;  %v1977_v16 = vmul.f32 %v2713_v10, %v1976_v44  ;;  %v1537_v2 = vsel %vm1533_vm8, %v1517_v56, %v3505_v25  ;;  %v1539_v17 = vsel %vm1535_vm9, %v3511_v55, %v1538_v34 }
  0xe9   :  { %v1557_v24 = vmul.u32 %v1553_v57, %v1551_v14  ;;  %v1558_v39 = vshll.u32 %v1555_v28, 16  ;;  %v1560_v35 = vshll.u32 %v1556_v40, 16  ;;  %v1576_v15 = vmul.u32 %v1574_v53, %v1550_v6 }
  0xea   :  { %vm2677_vm15 = vcmp.lt.s32.totalorder %v2676_v22, 0  ;;  %v1578_v9 = vmul.u32 %v1574_v53, %v1551_v14  ;;  %vm537_vm3 = vcmp.eq.s32.totalorder %v3472_v7, 0  ;;  %vm540_vm4 = vcmp.eq.s32.totalorder %v3472_v7, 2 }
  0xeb   :  { %v1455_v62 = vsel %vm2677_vm15, 0, %v2676_v22  ;;  %vm1562_vm5 = vc.u32 %v1554_v27, %v1558_v39  ;;  %v1564_v37 = vadd.s32 %v1558_v39, %v1554_v27  ;;  %v1580_v25 = vshll.u32 %v3579_v54, 16 }
  0xec   :  { %v1456_v31 = vsub.s32 32, %v1455_v62  ;;  %v1457_v55 = vshll.u32 %v3538_v30, %v1455_v62  ;;  %v1460_v56 = vsub.s32 4294967266, %v1455_v62  ;;  %v1563_v1 = vsel %vm1562_vm5, 1, %v2806_v5 }
  0xed   :  { %vm694_vm7 = vcmp.eq.s32.totalorder %v3566_v63, 2  ;;  %v1470_v6 = vsub.s32 4, %v3520_v52  ;;  %v1559_v57 = vshrl.u32 %v1555_v28, 16  ;;  %v1565_v3 = vadd.s32 %v1563_v1, %v1557_v24 }
  0xee   :  { %v1579_v34 = vmul.u32 %v1575_v11, %v1551_v14  ;;  %vm691_vm8 = vcmp.eq.s32.totalorder %v3566_v63, 0  ;;  %v1458_v53 = vshrl.u32 %v1440_v4, %v1456_v31  ;;  %v1461_v22 = vadd.s32 127, %v1460_v56 }
  0xef   :  { %vm1566_vm9 = vc.u32 %v1564_v37, %v1560_v35  ;;  %v1582_v27 = vshll.u32 %v1578_v9, 16  ;;  %vm536_vm10 = vcmp.lt.s32.totalorder %v3472_v7, 2  ;;  %v1561_v10 = vshrl.u32 %v1556_v40, 16 }
  0xf0   :  { %v1567_v30 = vsel %vm1566_vm9, 1, %v2806_v5  ;;  %vm1584_vm13 = vc.u32 %v1576_v15, %v1580_v25  ;;  %v1586_v39 = vadd.s32 %v1580_v25, %v1576_v15  ;;  %v1459_v62 = vor.u32 %v1458_v53, %v1457_v55  ;;  %v2714_v55 = vld [vmem:[#allocation8 + $0x28] sm:$0xff] }
  0xf1   :  { %v1462_v58 = vshll.u32 %v1461_v22, 23  ;;  %v1569_v28 = vadd.s32 %v1567_v30, %v1565_v3  ;;  %v1585_v14 = vsel %vm1584_vm13, 1, %v2806_v5  ;;  %vm690_vm14 = vcmp.lt.s32.totalorder %v3566_v63, 2 }
  0xf2   :  { %v1471_v11 = vsel %vm1348_vm2, %v1470_v6, %v3520_v52  ;;  %v1581_v4 = vshrl.u32 %v3579_v54, 16  ;;  %v1587_v40 = vadd.s32 %v1585_v14, %v1579_v34  ;;  %vm1588_vm0 = vc.u32 %v1586_v39, %v1582_v27 }
  0xf3   :  { %v1463_v24 = vor.u32 4788187, %v1462_v58  ;;  %v1466_v35 = vcvt.s32.f32 %v1459_v62  ;;  %v1570_v15 = vadd.s32 %v1569_v28, %v1559_v57  ;;  %v1589_v37 = vsel %vm1588_vm0, 1, %v2806_v5 }
  0xf4   :  { %v1583_v25 = vshrl.u32 %v1578_v9, 16  ;;  %v1591_v31 = vadd.s32 %v1589_v37, %v1587_v40  ;;  %v1978_v56 = vmul.f32 %v2714_v55, %v1976_v44  ;;  %v1979_v1 = vstv %s3592_s7 }
  0xf5   :  { %v1464_v3 = vand.u32 2147483647, %v1463_v24  ;;  %v3614_v53 = vadd.s32 %v1570_v15, %v1561_v10  ;;  %v3616_v22 = vadd.s32 %v1586_v39, %v1582_v27  ;;  %v3618_v52 = vadd.f32 %v1979_v1, %v1977_v16 }
  0xf6   :  { %vm3622_vm1 = vcmp.le.f32.partialorder %v1346_v51, 0.7853982  ;;  %v1540_v54 = vsel %vm1534_vm11, %v1537_v2, %v1539_v17  ;;  %v1592_v9 = vadd.s32 %v1591_v31, %v1581_v4  ;;  %v3628_v6 = vadd.f32 %v1979_v1, %v1978_v56 }
  0xf7   :  { %v539_v44 = vsel %vm537_vm3, %v3165_v8, %v229_v32  ;;  %v542_v51 = vsel %vm540_vm4, %v232_v50, %v3174_v59  ;;  %v1467_v16 = vmul.f32 %v1466_v35, %v1464_v3  ;;  %v3642_v0 = vsel %vm3622_vm1, 0, %v1471_v11 }
  0xf8   :  { %v1593_v2 = vadd.s32 %v1592_v9, %v1583_v25  ;;  %v1982_v17 = vand.u32 2147483647, %v3618_v52  ;;  %v1985_v57 = vand.u32 2139095040, %v3618_v52  ;;  %v2140_v34 = vand.u32 2139095040, %v3628_v6 }
  0xf9   :  { %v696_v8 = vsel %vm694_vm7, %v387_v21, %v3240_v19  ;;  %v1468_v32 = vxor.u32 2147483648, %v1467_v16  ;;  %v1594_v59 = vmul.u32 %v3516_v20, %v1540_v54  ;;  %vm1596_vm11 = vc.u32 %v3614_v53, %v3616_v22 }
  0xfa   :  { %v693_v50 = vsel %vm691_vm8, %v3228_v18, %v384_v42  ;;  %v1597_v27 = vadd.s32 1, %v1593_v2  ;;  %v1986_v10 = vshrl.u32 %v1985_v57, 23  ;;  %v2141_v30 = vshrl.u32 %v2140_v34, 23 }
  0xfb   :  { %v543_v39 = vsel %vm536_vm10, %v539_v44, %v542_v51  ;;  %v1469_v21 = vsel %vm1348_vm2, %v1468_v32, %v1467_v16  ;;  %v1490_v20 = vadd.s32 3, %v3642_v0  ;;  %v1989_v18 = vand.u32 8388607, %v1982_v17 }
  0xfc   :  { %v3668_v62 = vsel %vm3622_vm1, %v3221_v36, %v1469_v21  ;;  %v1598_v19 = vsel %vm1596_vm11, %v1597_v27, %v1593_v2  ;;  %v2687_v28 = vadd.s32 4294967169, %v1986_v10  ;;  %v697_v42 = vsel %vm690_vm14, %v693_v50, %v696_v8 }
  0xfd   :  { %v1330_v7 = vmul.f32 0.0, %v3424_v38  ;;  %v1474_v14 = vmul.f32 %v3668_v62, %v3668_v62  ;;  %v1599_v11 = vadd.s32 %v1598_v19, %v1594_v59  ;;  %v1328_v4 = vmul.f32 %v3442_v48, %v3323_v23 }
  0xfe   :  { %v1329_v40 = vmul.f32 %v3561_v46, %v3469_v60  ;;  %v1992_v24 = vadd.s32 1, %v2687_v28  ;;  %v2690_v35 = vadd.s32 4294967169, %v2141_v30  ;;  %v1331_v15 = vmul.f32 0.0, %v3557_v61 }
  0xff   :  { %v1475_v37 = vmul.f32 -0.001358992, %v1474_v14  ;;  %v1482_v25 = vmul.f32 -0.00019511016, %v1474_v14  ;;  %v1600_v63 = vadd.s32 536870912, %v1599_v11  ;;  %v3682_v31 = vand.u32 3, %v1490_v20 }
 0x100   :  { %v1990_v38 = vor.u32 8388608, %v1989_v18  ;;  %vm1993_vm2 = vcmp.gt.s32.totalorder %v1992_v24, 0  ;;  %v2137_v55 = vand.u32 2147483647, %v3628_v6  ;;  %v3687_v48 = vsel %vm224_vm6, nan, %v543_v39 }
 0x101   :  { %v1476_v56 = vadd.f32 0.041655596, %v1475_v37  ;;  %v1483_v1 = vadd.f32 0.008332121, %v1482_v25  ;;  %v1601_v3 = vshrl.u32 %v1600_v63, 30  ;;  %v1994_v23 = vsel %vm1993_vm2, %v1992_v24, 0 }
 0x102   :  { %v3691_v60 = vsel %vm379_vm12, nan, %v697_v42  ;;  %v3693_v61 = vsub.f32 %v1328_v4, %v1330_v7  ;;  %v2147_v46 = vadd.s32 1, %v2690_v35  ;;  %vm1503_vm15 = vcmp.lt.s32.totalorder %v3327_v29, 0 }
 0x103   :  { %v1477_v58 = vmul.f32 %v1476_v56, %v1474_v14  ;;  %v1484_v54 = vmul.f32 %v1483_v1, %v1474_v14  ;;  %v1602_v9 = vshll.u32 %v1601_v3, 30  ;;  %v3696_v44 = vsub.f32 %v1329_v40, %v1331_v15 }
 0x104   :  { %v1996_v51 = vand.u32 31, %v1994_v23  ;;  %v3698_v16 = vshll.u32 %v1990_v38, 8  ;;  %v3702_v12 = vand.u32 8388607, %v2137_v55  ;;  %vm1492_vm6 = vcmp.lt.s32.totalorder %v3682_v31, 2 }
 0x105   :  { %v1478_v13 = vadd.f32 -0.4999988, %v1477_v58  ;;  %v1485_v2 = vadd.f32 -0.16666654, %v1484_v54  ;;  %vm1493_vm12 = vcmp.eq.s32.totalorder %v3682_v31, 0  ;;  %v1603_v8 = vsub.s32 %v1599_v11, %v1602_v9 }
 0x106   :  { %v3993_v57 = vand.u32 2147483647, %v3327_v29  ;;  %vm1496_vm4 = vcmp.eq.s32.totalorder %v3682_v31, 2  ;;  %v1595_v32 = vadd.s32 %v3616_v22, %v3614_v53  ;;  %v1625_v59 = vsub.s32 4, %v1601_v3 }
 0x107   :  { %vm2148_vm5 = vcmp.gt.s32.totalorder %v2147_v46, 0  ;;  %v1479_v50 = vmul.f32 %v1478_v13, %v1474_v14  ;;  %v1486_v27 = vmul.f32 %v1485_v2, %v1474_v14  ;;  %vm1604_vm7 = vcmp.lt.s32.totalorder %v1603_v8, 0 }
 0x108   :  { %vm3708_vm3 = vcmp.le.f32.partialorder %v3993_v57, 0.7853982  ;;  %v1605_v10 = vsub.s32 0, %v1603_v8  ;;  %vm1489_vm8 = vweird.f32 %v3221_v36  ;;  %v1997_v30 = vsub.s32 32, %v1996_v51 }
 0x109   :  { %v3717_v39 = vand.u32 65535, %v3698_v16  ;;  %v3720_v21 = vshrl.u32 %v3698_v16, 16  ;;  %v2145_v20 = vor.u32 8388608, %v3702_v12  ;;  %v1480_v19 = vadd.f32 1.0, %v1479_v50 }
 0x10a   :  { %v1487_v28 = vadd.f32 1.0, %v1486_v27  ;;  %v1606_v53 = vsel %vm1604_vm7, %v1605_v10, %v1603_v8  ;;  %v3723_v22 = vshrl.u32 %v1994_v23, 5  ;;  %v1999_v42 = vshll.u32 %v2800_v41, %v1996_v51 }
 0x10b   :  { %v1607_v18 = vclz %v1606_v53  ;;  %v2002_v7 = vshll.u32 %v2801_v43, %v1996_v51  ;;  %v3728_v14 = vsel %vm2148_vm5, %v2147_v46, 0  ;;  %v1497_v4 = vxor.u32 2147483648, %v1480_v19 }
 0x10c   :  { %v1488_v11 = vmul.f32 %v1487_v28, %v3668_v62  ;;  %v1626_v40 = vsel %vm1503_vm15, %v1625_v59, %v1601_v3  ;;  %v2005_v24 = vshll.u32 %v2802_v45, %v1996_v51  ;;  %v2000_v15 = vshrl.u32 %v2801_v43, %v1997_v30 }
 0x10d   :  { %v2679_v35 = vadd.s32 4294967294, %v1607_v18  ;;  %v2003_v37 = vshrl.u32 %v2802_v45, %v1997_v30  ;;  %v2006_v25 = vshrl.u32 %v2803_v47, %v1997_v30  ;;  %v2008_v56 = vshll.u32 %v2803_v47, %v1996_v51 }
 0x10e   :  { %v1494_v63 = vxor.u32 2147483648, %v1488_v11  ;;  %v1498_v38 = vsel %vm1496_vm4, %v1497_v4, %v1488_v11  ;;  %v2009_v62 = vshrl.u32 %v2804_v49, %v1997_v30  ;;  %v1628_v1 = vsel %vm3708_vm3, 0, %v1626_v40 }
 0x10f   :  { %vm2680_vm9 = vcmp.lt.s32.totalorder %v2679_v35, 0  ;;  %v1998_v3 = vshrl.u32 %v2800_v41, %v1997_v30  ;;  %v2011_v23 = vshll.u32 %v2804_v49, %v1996_v51  ;;  %v1800_v54 = vand.u32 3, %v3642_v0 }
 0x110   :  { %v1495_v46 = vsel %vm1493_vm12, %v1480_v19, %v1494_v63  ;;  %v1610_v58 = vsel %vm2680_vm9, 0, %v2679_v35  ;;  %v3996_v9 = vmov 1326507024   ;;  %v2001_v27 = vor.u32 %v2000_v15, %v1999_v42 }
 0x111   :  { %v2012_v13 = vshrl.u32 %v3996_v9, %v1997_v30  ;;  %v1499_v2 = vsel %vm1492_vm6, %v1495_v46, %v1498_v38  ;;  %v1611_v57 = vsub.s32 32, %v1610_v58  ;;  %v1612_v59 = vshll.u32 %v1603_v8, %v1610_v58 }
 0x112   :  { %v1615_v50 = vsub.s32 4294967266, %v1610_v58  ;;  %v2004_v10 = vor.u32 %v2003_v37, %v2002_v7  ;;  %v2007_v28 = vor.u32 %v2006_v25, %v2005_v24  ;;  %v2010_v53 = vor.u32 %v2009_v62, %v2008_v56 }
 0x113   :  { %v1613_v18 = vshrl.u32 %v1595_v32, %v1611_v57  ;;  %vm1801_vm10 = vcmp.lt.s32.totalorder %v1800_v54, 2  ;;  %vm1802_vm13 = vcmp.eq.s32.totalorder %v1800_v54, 0  ;;  %v1500_v40 = vsel %vm1489_vm8, nan, %v1499_v2 }
 0x114   :  { %v1616_v51 = vadd.s32 127, %v1615_v50  ;;  %v1804_v0 = vsel %vm1802_vm13, %v1480_v19, %v1494_v63  ;;  %vm1805_vm14 = vcmp.eq.s32.totalorder %v1800_v54, 2  ;;  %vm2014_vm0 = vcmp.lt.s32.totalorder %v3723_v22, 1 }
 0x115   :  { %v1614_v31 = vor.u32 %v1613_v18, %v1612_v59  ;;  %v1807_v35 = vsel %vm1805_vm14, %v1497_v4, %v1488_v11  ;;  %v2013_v8 = vor.u32 %v2012_v13, %v2011_v23  ;;  %vm2015_vm1 = vcmp.lt.s32.totalorder %v3723_v22, 2 }
 0x116   :  { %v1617_v30 = vshll.u32 %v1616_v51, 23  ;;  %v1808_v38 = vsel %vm1801_vm10, %v1804_v0, %v1807_v35  ;;  %vm2016_vm11 = vcmp.lt.s32.totalorder %v3723_v22, 3  ;;  %vm2017_vm2 = vcmp.lt.s32.totalorder %v3723_v22, 4 }
 0x117   :  { %v1621_v42 = vcvt.s32.f32 %v1614_v31  ;;  %v1809_v7 = vsel %vm1489_vm8, nan, %v1808_v38  ;;  %v1966_v19 = vmul.f32 %v1500_v40, %v3687_v48  ;;  %v1645_v24 = vadd.s32 3, %v1628_v1 }
 0x118   :  { %v1618_v32 = vor.u32 4788187, %v1617_v30  ;;  %v1964_v15 = vmul.f32 %v1809_v7, %v3693_v61  ;;  %v1970_v11 = vmul.f32 %v1809_v7, %v3687_v48  ;;  %v1972_v4 = vmul.f32 %v1500_v40, %v3693_v61 }
 0x119   :  { %v2019_v25 = vsel %vm2017_vm2, %v2007_v28, 2102212464  ;;  %v2022_v63 = vsel %vm2014_vm0, %v2001_v27, %v2004_v10  ;;  %v2023_v36 = vsel %vm2017_vm2, %v2010_v53, 920167782  ;;  %v2026_v48 = vsel %vm2014_vm0, %v2004_v10, %v2007_v28 }
 0x11a   :  { %v1619_v37 = vand.u32 2147483647, %v1618_v32  ;;  %v3769_v56 = vadd.f32 %v1966_v19, %v1964_v15  ;;  %v1974_v62 = vsub.f32 %v1970_v11, %v1972_v4  ;;  %v2024_v23 = vsel %vm2016_vm11, %v2007_v28, %v2023_v36 }
 0x11b   :  { %v2018_v46 = vsel %vm2014_vm0, %v1998_v3, %v2001_v27  ;;  %v2025_v58 = vsel %vm2015_vm1, %v2022_v63, %v2024_v23  ;;  %v2027_v54 = vsel %vm2017_vm2, %v2013_v8, 1326507024  ;;  %v2020_v13 = vsel %vm2016_vm11, %v2004_v10, %v2019_v25 }
 0x11c   :  { %v1622_v61 = vmul.f32 %v1621_v42, %v1619_v37  ;;  %v2028_v2 = vsel %vm2016_vm11, %v2010_v53, %v2027_v54  ;;  %v2055_v57 = vand.u32 65535, %v2025_v58  ;;  %v2056_v59 = vshrl.u32 %v2025_v58, 16  ;;  %2618 = vst [vmem:[#allocation9 + $0x20] sm:$0xff] %v1974_v62 }
 0x11d   :  { %v3785_v28 = vand.u32 3, %v1645_v24  ;;  %v2029_v3 = vsel %vm2015_vm1, %v2026_v48, %v2028_v2  ;;  %v3790_v27 = vand.u32 31, %v3728_v14  ;;  %v3792_v18 = vand.u32 3, %v1628_v1 }
 0x11e   :  { %v1623_v50 = vxor.u32 2147483648, %v1622_v61  ;;  %v2033_v51 = vand.u32 65535, %v2029_v3  ;;  %v2034_v40 = vshrl.u32 %v2029_v3, 16  ;;  %v2058_v10 = vmul.u32 %v2056_v59, %v3717_v39 }
 0x11f   :  { %v3799_v0 = vsel %vm2015_vm1, %v2018_v46, %v2020_v13  ;;  %v2057_v31 = vmul.u32 %v2055_v57, %v3717_v39  ;;  %v2059_v30 = vmul.u32 %v2055_v57, %v3720_v21  ;;  %v2060_v32 = vmul.u32 %v2056_v59, %v3720_v21 }
 0x120   :  { %v1624_v53 = vsel %vm1503_vm15, %v1623_v50, %v1622_v61  ;;  %v2035_v35 = vmul.u32 %v2033_v51, %v3717_v39  ;;  %v2036_v8 = vmul.u32 %v2034_v40, %v3717_v39  ;;  %v2037_v38 = vmul.u32 %v2033_v51, %v3720_v21 }
 0x121   :  { %v3806_v1 = vsel %vm3708_vm3, %v3327_v29, %v1624_v53  ;;  %v2061_v42 = vshll.u32 %v2058_v10, 16  ;;  %v3815_v7 = vsub.s32 32, %v3790_v27  ;;  %v2038_v19 = vmul.u32 %v2034_v40, %v3720_v21 }
 0x122   :  { %v1629_v22 = vmul.f32 %v3806_v1, %v3806_v1  ;;  %v2039_v34 = vshll.u32 %v2036_v8, 16  ;;  %v2041_v24 = vshll.u32 %v2037_v38, 16  ;;  %v2062_v15 = vshrl.u32 %v2058_v10, 16 }
 0x123   :  { %v2040_v37 = vshrl.u32 %v2036_v8, 16  ;;  %v2063_v39 = vshll.u32 %v2059_v30, 16  ;;  %vm2065_vm6 = vc.u32 %v2057_v31, %v2061_v42  ;;  %v2067_v63 = vadd.s32 %v2061_v42, %v2057_v31 }
 0x124   :  { %v1630_v11 = vmul.f32 -0.001358992, %v1629_v22  ;;  %v1637_v4 = vmul.f32 -0.00019511016, %v1629_v22  ;;  %vm2043_vm15 = vc.u32 %v2035_v35, %v2039_v34  ;;  %v2045_v25 = vadd.s32 %v2039_v34, %v2035_v35 }
 0x125   :  { %v2044_v23 = vsel %vm2043_vm15, 1, %v2806_v5  ;;  %v2066_v48 = vsel %vm2065_vm6, 1, %v2806_v5  ;;  %vm1651_vm12 = vcmp.eq.s32.totalorder %v3785_v28, 2  ;;  %vm2069_vm4 = vc.u32 %v2067_v63, %v2063_v39 }
 0x126   :  { %v1631_v36 = vadd.f32 0.041655596, %v1630_v11  ;;  %v1638_v62 = vadd.f32 0.008332121, %v1637_v4  ;;  %v2046_v21 = vadd.s32 %v2044_v23, %v2038_v19  ;;  %vm2047_vm3 = vc.u32 %v2045_v25, %v2041_v24 }
 0x127   :  { %v2068_v61 = vadd.s32 %v2066_v48, %v2060_v32  ;;  %v2048_v54 = vsel %vm2047_vm3, 1, %v2806_v5  ;;  %v2070_v13 = vsel %vm2069_vm4, 1, %v2806_v5  ;;  %vm1648_vm5 = vcmp.eq.s32.totalorder %v3785_v28, 0 }
 0x128   :  { %v1632_v46 = vmul.f32 %v1631_v36, %v1629_v22  ;;  %v1639_v58 = vmul.f32 %v1638_v62, %v1629_v22  ;;  %v2042_v2 = vshrl.u32 %v2037_v38, 16  ;;  %v2050_v57 = vadd.s32 %v2048_v54, %v2046_v21 }
 0x129   :  { %v2064_v59 = vshrl.u32 %v2059_v30, 16  ;;  %v2072_v50 = vadd.s32 %v2070_v13, %v2068_v61  ;;  %vm1647_vm7 = vcmp.lt.s32.totalorder %v3785_v28, 2  ;;  %vm1955_vm8 = vcmp.lt.s32.totalorder %v3792_v18, 2 }
 0x12a   :  { %v1633_v3 = vadd.f32 -0.4999988, %v1632_v46  ;;  %v1640_v51 = vadd.f32 -0.16666654, %v1639_v58  ;;  %vm1959_vm9 = vcmp.eq.s32.totalorder %v3792_v18, 2  ;;  %vm1644_vm10 = vweird.f32 %v3327_v29 }
 0x12b   :  { %v2051_v40 = vadd.s32 %v2050_v57, %v2040_v37  ;;  %v3828_v10 = vadd.s32 %v2067_v63, %v2063_v39  ;;  %v2073_v53 = vadd.s32 %v2072_v50, %v2062_v15  ;;  %v2075_v31 = vmul.u32 %v3698_v16, %v3799_v0 }
 0x12c   :  { %v1634_v35 = vmul.f32 %v1633_v3, %v1629_v22  ;;  %v1641_v30 = vmul.f32 %v1640_v51, %v1629_v22  ;;  %v2154_v8 = vshll.u32 %v2800_v41, %v3790_v27  ;;  %v2155_v38 = vshrl.u32 %v2801_v43, %v3815_v7 }
 0x12d   :  { %v3836_v32 = vadd.s32 %v2051_v40, %v2042_v2  ;;  %v2074_v42 = vadd.s32 %v2073_v53, %v2064_v59  ;;  %v2157_v19 = vshll.u32 %v2801_v43, %v3790_v27  ;;  %v2158_v34 = vshrl.u32 %v2802_v45, %v3815_v7 }
 0x12e   :  { %v1635_v24 = vadd.f32 1.0, %v1634_v35  ;;  %v1642_v15 = vadd.f32 1.0, %v1641_v30  ;;  %v2160_v16 = vshll.u32 %v2802_v45, %v3790_v27  ;;  %v2161_v0 = vshrl.u32 %v2803_v47, %v3815_v7 }
 0x12f   :  { %vm2077_vm13 = vc.u32 %v3836_v32, %v3828_v10  ;;  %v2078_v22 = vadd.s32 1, %v2074_v42  ;;  %v2163_v11 = vshll.u32 %v2803_v47, %v3790_v27  ;;  %v2164_v43 = vshrl.u32 %v2804_v49, %v3815_v7 }
 0x130   :  { %v1643_v4 = vmul.f32 %v1642_v15, %v3806_v1  ;;  %v1652_v37 = vxor.u32 2147483648, %v1635_v24  ;;  %vm1956_vm14 = vcmp.eq.s32.totalorder %v3792_v18, 0  ;;  %v3855_v45 = vshrl.u32 %v3728_v14, 5 }
 0x131   :  { %v2079_v39 = vsel %vm2077_vm13, %v2078_v22, %v2074_v42  ;;  %v2166_v25 = vshll.u32 %v2804_v49, %v3790_v27  ;;  %v2167_v63 = vshrl.u32 %v3996_v9, %v3815_v7  ;;  %v3863_v47 = vshll.u32 %v2145_v20, 8 }
 0x132   :  { %v1649_v36 = vxor.u32 2147483648, %v1643_v4  ;;  %v1653_v1 = vsel %vm1651_vm12, %v1652_v37, %v1643_v4  ;;  %v1961_v62 = vsel %vm1959_vm9, %v1652_v37, %v1643_v4  ;;  %v2080_v14 = vadd.s32 %v2079_v39, %v2075_v31 }
 0x133   :  { %v3869_v23 = vor.u32 %v2155_v38, %v2154_v8  ;;  %v3871_v48 = vor.u32 %v2158_v34, %v2157_v19  ;;  %v3873_v49 = vor.u32 %v2161_v0, %v2160_v16  ;;  %v2165_v27 = vor.u32 %v2164_v43, %v2163_v11 }
 0x134   :  { %v1650_v12 = vsel %vm1648_vm5, %v1635_v24, %v1649_v36  ;;  %v1958_v20 = vsel %vm1956_vm14, %v1635_v24, %v1649_v36  ;;  %v2081_v9 = vadd.s32 536870912, %v2080_v14  ;;  %vm2169_vm0 = vcmp.lt.s32.totalorder %v3855_v45, 1 }
 0x135   :  { %v1654_v21 = vsel %vm1647_vm7, %v1650_v12, %v1653_v1  ;;  %v1962_v61 = vsel %vm1955_vm8, %v1958_v20, %v1961_v62  ;;  %v2168_v46 = vor.u32 %v2167_v63, %v2166_v25  ;;  %vm2171_vm1 = vcmp.lt.s32.totalorder %v3855_v45, 3 }
 0x136   :  { %v1655_v58 = vsel %vm1644_vm10, nan, %v1654_v21  ;;  %v1963_v54 = vsel %vm1644_vm10, nan, %v1962_v61  ;;  %v3887_v13 = vshrl.u32 %v2081_v9, 30  ;;  %vm2172_vm11 = vcmp.lt.s32.totalorder %v3855_v45, 4 }
 0x137   :  { %v1965_v2 = vmul.f32 %v1963_v54, %v3696_v44  ;;  %v1967_v28 = vmul.f32 %v1655_v58, %v3691_v60  ;;  %v1971_v18 = vmul.f32 %v1963_v54, %v3691_v60  ;;  %v1973_v57 = vmul.f32 %v1655_v58, %v3696_v44 }
 0x138   :  { %v2083_v59 = vshll.u32 %v3887_v13, 30  ;;  %vm2170_vm2 = vcmp.lt.s32.totalorder %v3855_v45, 2  ;;  %v2177_v29 = vsel %vm2169_vm0, %v3869_v23, %v3871_v48  ;;  %v2178_v51 = vsel %vm2172_vm11, %v2165_v27, 920167782 }
 0x139   :  { %v3900_v50 = vadd.f32 %v1967_v28, %v1965_v2  ;;  %v1975_v3 = vsub.f32 %v1971_v18, %v1973_v57  ;;  %v2181_v60 = vsel %vm2169_vm0, %v3871_v48, %v3873_v49  ;;  %v2179_v40 = vsel %vm2171_vm1, %v3873_v49, %v2178_v51 }
 0x13a   :  { %v2084_v44 = vsub.s32 %v2080_v14, %v2083_v59  ;;  %v2182_v53 = vsel %vm2172_vm11, %v2168_v46, 1326507024  ;;  %v2180_v31 = vsel %vm2170_vm2, %v2177_v29, %v2179_v40  ;;  %v2186_v30 = vand.u32 65535, %v3863_v47 }
 0x13b   :  { %v2183_v35 = vsel %vm2171_vm1, %v2165_v27, %v2182_v53  ;;  %2619 = vst [vmem:[#allocation9 + $0x28] sm:$0xff] %v1975_v3  ;;  %v2187_v42 = vshrl.u32 %v3863_v47, 16  ;;  %v2211_v24 = vshrl.u32 %v2180_v31, 16  ;;  %v2210_v16 = vand.u32 65535, %v2180_v31 }
 0x13c   :  { %vm2085_vm15 = vcmp.lt.s32.totalorder %v2084_v44, 0  ;;  %v2086_v8 = vsub.s32 0, %v2084_v44  ;;  %v2184_v38 = vsel %vm2170_vm2, %v2181_v60, %v2183_v35  ;;  %v2076_v63 = vadd.s32 %v3828_v10, %v3836_v32 }
 0x13d   :  { %v2188_v19 = vand.u32 65535, %v2184_v38  ;;  %v2189_v34 = vshrl.u32 %v2184_v38, 16  ;;  %v2213_v4 = vmul.u32 %v2211_v24, %v2186_v30  ;;  %v2153_v36 = vshrl.u32 %v2800_v41, %v3815_v7 }
 0x13e   :  { %v2087_v15 = vsel %vm2085_vm15, %v2086_v8, %v2084_v44  ;;  %v2214_v14 = vmul.u32 %v2210_v16, %v2187_v42  ;;  %v2212_v20 = vmul.u32 %v2210_v16, %v2186_v30  ;;  %v2215_v41 = vmul.u32 %v2211_v24, %v2187_v42 }
 0x13f   :  { %v2088_v0 = vclz %v2087_v15  ;;  %v2190_v22 = vmul.u32 %v2188_v19, %v2186_v30  ;;  %v2191_v11 = vmul.u32 %v2189_v34, %v2186_v30  ;;  %v2192_v43 = vmul.u32 %v2188_v19, %v2187_v42 }
 0x140   :  { %v2193_v39 = vmul.u32 %v2189_v34, %v2187_v42  ;;  %v2216_v9 = vshll.u32 %v2213_v4, 16  ;;  %v2173_v10 = vsel %vm2169_vm0, %v2153_v36, %v3869_v23  ;;  %v2218_v28 = vshll.u32 %v2214_v14, 16 }
 0x141   :  { %v2688_v37 = vadd.s32 4294967294, %v2088_v0  ;;  %v2194_v25 = vshll.u32 %v2191_v11, 16  ;;  %v2196_v1 = vshll.u32 %v2192_v43, 16  ;;  %v2195_v32 = vshrl.u32 %v2191_v11, 16 }
 0x142   :  { %v2174_v18 = vsel %vm2172_vm11, %v3873_v49, 2102212464  ;;  %vm2220_vm4 = vc.u32 %v2212_v20, %v2216_v9  ;;  %v2222_v59 = vadd.s32 %v2216_v9, %v2212_v20  ;;  %v2197_v51 = vshrl.u32 %v2192_v43, 16 }
 0x143   :  { %vm2689_vm6 = vcmp.lt.s32.totalorder %v2688_v37, 0  ;;  %vm2198_vm12 = vc.u32 %v2190_v22, %v2194_v25  ;;  %v2200_v62 = vadd.s32 %v2194_v25, %v2190_v22  ;;  %v2221_v23 = vsel %vm2220_vm4, 1, %v2806_v5 }
 0x144   :  { %v2091_v27 = vsel %vm2689_vm6, 0, %v2688_v37  ;;  %v2199_v12 = vsel %vm2198_vm12, 1, %v2806_v5  ;;  %v2223_v40 = vadd.s32 %v2221_v23, %v2215_v41  ;;  %vm2224_vm5 = vc.u32 %v2222_v59, %v2218_v28 }
 0x145   :  { %v2092_v21 = vsub.s32 32, %v2091_v27  ;;  %v2093_v61 = vshll.u32 %v2084_v44, %v2091_v27  ;;  %v2096_v46 = vsub.s32 4294967266, %v2091_v27  ;;  %v2201_v58 = vadd.s32 %v2199_v12, %v2193_v39 }
 0x146   :  { %vm2202_vm3 = vc.u32 %v2200_v62, %v2196_v1  ;;  %v2217_v44 = vshrl.u32 %v2213_v4, 16  ;;  %v2175_v35 = vsel %vm2171_vm1, %v3871_v48, %v2174_v18  ;;  %v2225_v49 = vsel %vm2224_vm5, 1, %v2806_v5 }
 0x147   :  { %v2094_v7 = vshrl.u32 %v2076_v63, %v2092_v21  ;;  %v2097_v54 = vadd.s32 127, %v2096_v46  ;;  %v2203_v2 = vsel %vm2202_vm3, 1, %v2806_v5  ;;  %v2219_v30 = vshrl.u32 %v2214_v14, 16 }
 0x148   :  { %v2205_v57 = vadd.s32 %v2203_v2, %v2201_v58  ;;  %v2227_v8 = vadd.s32 %v2225_v49, %v2223_v40  ;;  %v2226_v19 = vadd.s32 %v2222_v59, %v2218_v28  ;;  %v2176_v34 = vsel %vm2170_vm2, %v2173_v10, %v2175_v35 }
 0x149   :  { %v2095_v29 = vor.u32 %v2094_v7, %v2093_v61  ;;  %v2098_v3 = vshll.u32 %v2097_v54, 23  ;;  %vm1984_vm7 = vcmp.lt.s32.totalorder %v3618_v52, 0  ;;  %v2106_v16 = vsub.s32 4, %v3887_v13 }
 0x14a   :  { %v2206_v60 = vadd.s32 %v2205_v57, %v2195_v32  ;;  %v2228_v24 = vadd.s32 %v2227_v8, %v2217_v44  ;;  %vm1983_vm8 = vcmp.le.f32.partialorder %v1982_v17, 0.7853982  ;;  %v2230_v5 = vmul.u32 %v3863_v47, %v2176_v34 }
 0x14b   :  { %v2099_v53 = vor.u32 4788187, %v2098_v3  ;;  %v2102_v31 = vcvt.s32.f32 %v2095_v29  ;;  %v2107_v43 = vsel %vm1984_vm7, %v2106_v16, %v3887_v13  ;;  %vm2125_vm11 = vweird.f32 %v3618_v52 }
 0x14c   :  { %v2207_v42 = vadd.s32 %v2206_v60, %v2197_v51  ;;  %v2229_v0 = vadd.s32 %v2228_v24, %v2219_v30  ;;  %v2109_v25 = vsel %vm1983_vm8, 0, %v2107_v43  ;;  %vm2139_vm12 = vcmp.lt.s32.totalorder %v3628_v6, 0 }
 0x14d   :  { %v2100_v38 = vand.u32 2147483647, %v2099_v53  ;;  %v2126_v27 = vadd.s32 3, %v2109_v25  ;;  %v2436_v23 = vand.u32 3, %v2109_v25  ;;  %vm2138_vm3 = vcmp.le.f32.partialorder %v2137_v55, 0.7853982 }
 0x14e   :  { %vm2232_vm9 = vc.u32 %v2207_v42, %v2226_v19  ;;  %v2233_v22 = vadd.s32 1, %v2229_v0  ;;  %v2231_v29 = vadd.s32 %v2226_v19, %v2207_v42 }
 0x14f   :  { %v2103_v15 = vmul.f32 %v2102_v31, %v2100_v38  ;;  %v2127_v61 = vand.u32 3, %v2126_v27  ;;  %vm2437_vm2 = vcmp.lt.s32.totalorder %v2436_v23, 2  ;;  %vm2438_vm15 = vcmp.eq.s32.totalorder %v2436_v23, 0 }
 0x150   :  { %v2234_v4 = vsel %vm2232_vm9, %v2233_v22, %v2229_v0  ;;  %vm2441_vm6 = vcmp.eq.s32.totalorder %v2436_v23, 2 }
 0x151   :  { %v2104_v48 = vxor.u32 2147483648, %v2103_v15  ;;  %v2235_v39 = vadd.s32 %v2234_v4, %v2230_v5  ;;  %vm2132_vm13 = vcmp.eq.s32.totalorder %v2127_v61, 2  ;;  %vm2129_vm14 = vcmp.eq.s32.totalorder %v2127_v61, 0 }
 0x152   :  { %vm2128_vm0 = vcmp.lt.s32.totalorder %v2127_v61, 2 }
 0x153   :  { %v2105_v11 = vsel %vm1984_vm7, %v2104_v48, %v2103_v15  ;;  %v2236_v1 = vadd.s32 536870912, %v2235_v39 }
 0x154   :  { %v2108_v45 = vsel %vm1983_vm8, %v3618_v52, %v2105_v11 }
 0x155   :  { %v2110_v37 = vmul.f32 %v2108_v45, %v2108_v45  ;;  %v3947_v17 = vshrl.u32 %v2236_v1, 30 }
 0x157   :  { %v2111_v63 = vmul.f32 -0.001358992, %v2110_v37  ;;  %v2118_v36 = vmul.f32 -0.00019511016, %v2110_v37  ;;  %v2238_v20 = vshll.u32 %v3947_v17, 30  ;;  %v2261_v4 = vsub.s32 4, %v3947_v17 }
 0x159   :  { %v2112_v62 = vadd.f32 0.041655596, %v2111_v63  ;;  %v2119_v14 = vadd.f32 0.008332121, %v2118_v36  ;;  %v2239_v21 = vsub.s32 %v2235_v39, %v2238_v20  ;;  %v2262_v39 = vsel %vm2139_vm12, %v2261_v4, %v3947_v17 }
 0x15a   :  { %v2264_v25 = vsel %vm2138_vm3, 0, %v2262_v39 }
 0x15b   :  { %v2113_v47 = vmul.f32 %v2112_v62, %v2110_v37  ;;  %v2120_v12 = vmul.f32 %v2119_v14, %v2110_v37  ;;  %vm2240_vm10 = vcmp.lt.s32.totalorder %v2239_v21, 0  ;;  %v2241_v10 = vsub.s32 0, %v2239_v21 }
 0x15c   :  { %v2281_v14 = vadd.s32 3, %v2264_v25  ;;  %v2590_v55 = vand.u32 3, %v2264_v25 }
 0x15d   :  { %v2114_v9 = vadd.f32 -0.4999988, %v2113_v47  ;;  %v2121_v13 = vadd.f32 -0.16666654, %v2120_v12  ;;  %v2242_v7 = vsel %vm2240_vm10, %v2241_v10, %v2239_v21 }
 0x15e   :  { %v2243_v54 = vclz %v2242_v7  ;;  %vm2595_vm5 = vcmp.eq.s32.totalorder %v2590_v55, 2  ;;  %vm2592_vm9 = vcmp.eq.s32.totalorder %v2590_v55, 0  ;;  %vm2591_vm10 = vcmp.lt.s32.totalorder %v2590_v55, 2 }
 0x15f   :  { %v2115_v46 = vmul.f32 %v2114_v9, %v2110_v37  ;;  %v2122_v58 = vmul.f32 %v2121_v13, %v2110_v37  ;;  %v2282_v9 = vand.u32 3, %v2281_v14 }
 0x160   :  { %v2691_v18 = vadd.s32 4294967294, %v2243_v54 }
 0x161   :  { %v2116_v32 = vadd.f32 1.0, %v2115_v46  ;;  %v2123_v41 = vadd.f32 1.0, %v2122_v58  ;;  %vm2287_vm4 = vcmp.eq.s32.totalorder %v2282_v9, 2  ;;  %vm2283_vm7 = vcmp.lt.s32.totalorder %v2282_v9, 2 }
 0x162   :  { %vm2692_vm1 = vcmp.lt.s32.totalorder %v2691_v18, 0  ;;  %vm2284_vm8 = vcmp.eq.s32.totalorder %v2282_v9, 0 }
 0x163   :  { %v2124_v2 = vmul.f32 %v2123_v41, %v2108_v45  ;;  %v2133_v28 = vxor.u32 2147483648, %v2116_v32  ;;  %v2246_v51 = vsel %vm2692_vm1, 0, %v2691_v18 }
 0x164   :  { %v2247_v44 = vsub.s32 32, %v2246_v51  ;;  %v2248_v40 = vshll.u32 %v2239_v21, %v2246_v51  ;;  %v2251_v53 = vsub.s32 4294967266, %v2246_v51 }
 0x165   :  { %v2130_v57 = vxor.u32 2147483648, %v2124_v2  ;;  %v2134_v59 = vsel %vm2132_vm13, %v2133_v28, %v2124_v2  ;;  %v2443_v42 = vsel %vm2441_vm6, %v2133_v28, %v2124_v2  ;;  %vm2280_vm13 = vweird.f32 %v3628_v6 }
 0x166   :  { %v2249_v31 = vshrl.u32 %v2231_v29, %v2247_v44  ;;  %v2252_v35 = vadd.s32 127, %v2251_v53 }
 0x167   :  { %v2131_v3 = vsel %vm2129_vm14, %v2116_v32, %v2130_v57  ;;  %v2440_v30 = vsel %vm2438_vm15, %v2116_v32, %v2130_v57 }
 0x168   :  { %v2135_v60 = vsel %vm2128_vm0, %v2131_v3, %v2134_v59  ;;  %v2250_v8 = vor.u32 %v2249_v31, %v2248_v40  ;;  %v2253_v38 = vshll.u32 %v2252_v35, 23  ;;  %v2444_v19 = vsel %vm2437_vm2, %v2440_v30, %v2443_v42 }
 0x169   :  { %v2136_v49 = vsel %vm2125_vm11, nan, %v2135_v60  ;;  %v2445_v15 = vsel %vm2125_vm11, nan, %v2444_v19 }
 0x16a   :  { %v2254_v34 = vor.u32 4788187, %v2253_v38  ;;  %v2257_v24 = vcvt.s32.f32 %v2250_v8  ;;  %v2602_v16 = vmul.f32 %v2136_v49, %v3449_v26  ;;  %v2600_v0 = vmul.f32 %v2445_v15, %v3769_v56 }
 0x16b   :  { %v2606_v48 = vmul.f32 %v2136_v49, %v3769_v56  ;;  %v2608_v5 = vmul.f32 %v2445_v15, %v3449_v26 }
 0x16c   :  { %v2255_v22 = vand.u32 2147483647, %v2254_v34  ;;  %v2604_v11 = vsub.f32 %v2600_v0, %v2602_v16 }
 0x16d   :  { %v2610_v43 = vadd.f32 %v2608_v5, %v2606_v48 }
 0x16e   :  { %v2258_v45 = vmul.f32 %v2257_v24, %v2255_v22  ;;  %2612 = vst [vmem:[#allocation9] sm:$0xff] %v2604_v11 }
 0x16f   :  { %2615 = vst [vmem:[#allocation9 + $0x10] sm:$0xff] %v2610_v43 }
 0x170   :  { %v2259_v52 = vxor.u32 2147483648, %v2258_v45 }
 0x172   :  { %v2260_v37 = vsel %vm2139_vm12, %v2259_v52, %v2258_v45 }
 0x173   :  { %v2263_v56 = vsel %vm2138_vm3, %v3628_v6, %v2260_v37 }
 0x174   :  { %v2265_v26 = vmul.f32 %v2263_v56, %v2263_v56 }
 0x176   :  { %v2266_v63 = vmul.f32 -0.001358992, %v2265_v26  ;;  %v2273_v36 = vmul.f32 -0.00019511016, %v2265_v26 }
 0x178   :  { %v2267_v1 = vadd.f32 0.041655596, %v2266_v63  ;;  %v2274_v62 = vadd.f32 0.008332121, %v2273_v36 }
 0x17a   :  { %v2268_v27 = vmul.f32 %v2267_v1, %v2265_v26  ;;  %v2275_v47 = vmul.f32 %v2274_v62, %v2265_v26 }
 0x17c   :  { %v2269_v12 = vadd.f32 -0.4999988, %v2268_v27  ;;  %v2276_v20 = vadd.f32 -0.16666654, %v2275_v47 }
 0x17e   :  { %v2270_v13 = vmul.f32 %v2269_v12, %v2265_v26  ;;  %v2277_v21 = vmul.f32 %v2276_v20, %v2265_v26 }
 0x180   :  { %v2271_v61 = vadd.f32 1.0, %v2270_v13  ;;  %v2278_v46 = vadd.f32 1.0, %v2277_v21 }
 0x182   :  { %v2279_v17 = vmul.f32 %v2278_v46, %v2263_v56  ;;  %v2288_v58 = vxor.u32 2147483648, %v2271_v61 }
 0x184   :  { %v2285_v10 = vxor.u32 2147483648, %v2279_v17  ;;  %v2289_v32 = vsel %vm2287_vm4, %v2288_v58, %v2279_v17  ;;  %v2597_v41 = vsel %vm2595_vm5, %v2288_v58, %v2279_v17 }
 0x186   :  { %v2286_v7 = vsel %vm2284_vm8, %v2271_v61, %v2285_v10  ;;  %v2594_v54 = vsel %vm2592_vm9, %v2271_v61, %v2285_v10 }
 0x187   :  { %v2290_v2 = vsel %vm2283_vm7, %v2286_v7, %v2289_v32  ;;  %v2598_v28 = vsel %vm2591_vm10, %v2594_v54, %v2597_v41 }
 0x188   :  { %v2291_v18 = vsel %vm2280_vm13, nan, %v2290_v2  ;;  %v2599_v57 = vsel %vm2280_vm13, nan, %v2598_v28 }
 0x189   :  { %v2601_v59 = vmul.f32 %v2599_v57, %v3900_v50  ;;  %v2603_v29 = vmul.f32 %v2291_v18, %v3575_v33  ;;  %v2607_v3 = vmul.f32 %v2291_v18, %v3900_v50  ;;  %v2609_v51 = vmul.f32 %v2599_v57, %v3575_v33 }
 0x18b   :  { %v2605_v6 = vsub.f32 %v2601_v59, %v2603_v29  ;;  %v2611_v23 = vadd.f32 %v2609_v51, %v2607_v3 }
 0x18d   :  { %2613 = vst [vmem:[#allocation9 + $0x8] sm:$0xff] %v2605_v6 }
 0x18e   :  { %2616 = vst [vmem:[#allocation9 + $0x18] sm:$0xff] %v2611_v23 }
 0x18f   :  { %2632 = dma.vmem_to_hbm [thread:$0]  %s2625_s9, 768, %s2627_s12, [#allocation4], %s2798_s25, %s2798_s25, %s2799_s0  }
 0x190   :  { %2793 = dma.done.wait [#allocation4], 768  }
 0x191   :  { %2794 = vsyncadd [#allocation4], 4294966528 }
 0x192   :  { %2637 = vsyncpa [#allocation3], 1 }
 0x193   :  { %2638 = vsyncpa [#allocation4], 1 }
 0x194   :  { %2639 = vsyncpa [#allocation5], 1 }
 0x195   :  { %2640 = vsyncpa [#allocation7], 1 }

</bundles_post_ra>
